<compile_context>
chip_gen: v7x
topology: tpu7x:2x2x1
jax: 0.10.0
libtpu: 0.0.40
codegen_flags: <defaults>
</compile_context>

<pallas_src>
import functools
import math

import jax
import jax.numpy as jnp
from jax import lax
from jax.experimental import pallas as pl
from jax.experimental.pallas import tpu as pltpu

LN_EPS = 1e-5


# ----------------------------------------------------------------------------
# Packed-parameter layouts (row offsets; everything 8-sublane aligned)
# ----------------------------------------------------------------------------
def _r8(n):
    return ((n + 7) // 8) * 8


def _wm_layout(E, F):
    """Per-block matrix pack [wqkv; wo; w1; w2], lane width = max(E, F)."""
    o_qkv = 0
    o_wo = o_qkv + _r8(3 * E)
    o_w1 = o_wo + _r8(E)
    o_w2 = o_w1 + _r8(F)
    rows = o_w2 + _r8(E)
    return dict(qkv=o_qkv, wo=o_wo, w1=o_w1, w2=o_w2, rows=rows,
                width=max(E, F))


def _wv_layout(E, F):
    """Per-block vector pack [bqkv; bo; b1; b2; ln1w; ln1b; ln2w; ln2b], width 1."""
    names = [("bqkv", 3 * E), ("bo", E), ("b1", F), ("b2", E),
             ("ln1w", E), ("ln1b", E), ("ln2w", E), ("ln2b", E)]
    off, out = 0, {}
    for n, ln in names:
        out[n] = off
        off += _r8(ln)
    out["rows"] = off
    return out


def _g_layout(E, H):
    """Globals pack: pe_w column, head reduce/expand matrices, LN moment matrix."""
    o_pe = 0
    o_hsum = o_pe + _r8(E)
    o_hexp = o_hsum + _r8(H)
    o_mom = o_hexp + _r8(E)
    rows = o_mom + 8
    return dict(pe=o_pe, hsum=o_hsum, hexp=o_hexp, mom=o_mom, rows=rows,
                width=max(2 * E, 8))


# ----------------------------------------------------------------------------
# Fused kernel: embedding + NB encoder blocks + per-tile fc partial
# ----------------------------------------------------------------------------
def vit_fused_kernel(tok_ref, fcw_ref, g_ref, wm_ref, wv_ref, o_ref, *,
                     nb, e, f, nh, b, t):
    """One grid step (one tile of S positions).

    tok_ref : (E+1, B*T)   rows 0..E-1 = pos_embed + patch bias (pre-tiled,
                           b-major lanes), row E = flattened pixel values.
    fcw_ref : (T*E, S_out) fc weight rows for this tile, e-major order.
    g_ref   : (Gr, Gw)     packed globals.
    wm_ref  : (NB, RW, W)  packed per-block matrices [wqkv; wo; w1; w2].
    wv_ref  : (NB, RV, 1)  packed per-block vectors  [bqkv; bo; b1; b2; ln*].
    o_ref   : (B, S_out)   this tile's partial fc output (bias added in XLA).
    """
    gl = _g_layout(e, nh)
    ml = _wm_layout(e, f)
    vl = _wv_layout(e, f)

    def dotf(a, bb):
        return jnp.dot(a, bb, preferred_element_type=jnp.float32)

    # globals (static sublane/lane slices of the packed array — zero cost)
    pe_w = g_ref[gl["pe"]:gl["pe"] + e, 0:1]              # (E, 1)
    hsum = g_ref[gl["hsum"]:gl["hsum"] + nh, 0:e]         # (H, E) head reduce
    hexp = g_ref[gl["hexp"]:gl["hexp"] + e, 0:nh]         # (E, H) head expand
    mom = g_ref[gl["mom"]:gl["mom"] + 2, 0:2 * e]         # (2, 2E) LN moments

    def layer_norm(z, w, bb):
        # mean and mean-of-squares via ONE MXU dot (instead of two XLU
        # cross-sublane reductions); biased variance, eps inside the sqrt,
        # matching nn.LayerNorm.
        zz = jnp.concatenate([z, z * z], axis=0)          # (2E, B*T)
        m = dotf(mom, zz)                                  # (2, B*T)
        mu = m[0:1, :]
        var = m[1:2, :] - mu * mu
        return (z - mu) * lax.rsqrt(var + LN_EPS) * w + bb

    # ---- patch_to_embedding + pos_embed: a single broadcasted FMA ----------
    pos_b = tok_ref[0:e, :]                               # (E, B*T)
    x_row = tok_ref[e:e + 1, :]                           # (1, B*T)
    hcur = pe_w * x_row + pos_b                           # (E, B*T) slab

    # ---- transformer encoder blocks (post-norm, relu) -----------------------
    # The module feeds (B, S, E) to TransformerEncoderLayer with
    # batch_first=False, so attention mixes the *batch* axis independently per
    # position; in the slab a lane roll by j*T aligns every query with the
    # key/value of another image at the same position.
    for blk in range(nb):
        wqkv = wm_ref[blk, ml["qkv"]:ml["qkv"] + 3 * e, 0:e]
        bqkv = wv_ref[blk, vl["bqkv"]:vl["bqkv"] + 3 * e, :]
        qkv = dotf(wqkv, hcur) + bqkv                     # fused q/k/v (3E, B*T)
        q = qkv[0:e]              # 1/sqrt(head_dim) pre-folded into wq / bq
        k = qkv[e:2 * e]
        v = qkv[2 * e:3 * e]

        scores, vals = [], []
        row_max = None
        for j in range(b):        # B is tiny (=2); lists stay a few vregs
            kj = k if j == 0 else pltpu.roll(k, shift=j * t, axis=1)
            vj = v if j == 0 else pltpu.roll(v, shift=j * t, axis=1)
            sj = dotf(hsum, q * kj)                       # (H, B*T) per-head
            scores.append(sj)
            vals.append(vj)
            row_max = sj if row_max is None else jnp.maximum(row_max, sj)

        denom, attn = None, None
        for j in range(b):
            pj = jnp.exp(scores[j] - row_max)             # (H, B*T)
            denom = pj if denom is None else denom + pj
            c = dotf(hexp, pj) * vals[j]                  # (E, B*T)
            attn = c if attn is None else attn + c
        attn = attn * dotf(hexp, pl.reciprocal(denom, approx=True))

        wo = wm_ref[blk, ml["wo"]:ml["wo"] + e, 0:e]
        bo = wv_ref[blk, vl["bo"]:vl["bo"] + e, :]
        attn = dotf(wo, attn) + bo                        # output projection

        ln1w = wv_ref[blk, vl["ln1w"]:vl["ln1w"] + e, :]
        ln1b = wv_ref[blk, vl["ln1b"]:vl["ln1b"] + e, :]
        z = layer_norm(hcur + attn, ln1w, ln1b)           # norm1

        w1 = wm_ref[blk, ml["w1"]:ml["w1"] + f, 0:e]
        b1 = wv_ref[blk, vl["b1"]:vl["b1"] + f, :]
        w2 = wm_ref[blk, ml["w2"]:ml["w2"] + e, 0:f]
        b2 = wv_ref[blk, vl["b2"]:vl["b2"] + e, :]
        ff = jnp.maximum(dotf(w1, z) + b1, 0.0)           # FFN (relu)
        ff = dotf(w2, ff) + b2

        ln2w = wv_ref[blk, vl["ln2w"]:vl["ln2w"] + e, :]
        ln2b = wv_ref[blk, vl["ln2b"]:vl["ln2b"] + e, :]
        hcur = layer_norm(z + ff, ln2w, ln2b)             # norm2

    # ---- fc partial for this tile, kept in slab layout (no h.T relayout) ---
    # out[b, o] = sum_e  h[e, b*T:(b+1)*T] @ fcw[e*T:(e+1)*T, :]
    for bi in range(b):
        acc = None
        for ei in range(e):
            he = hcur[ei:ei + 1, bi * t:(bi + 1) * t]     # (1, T)
            we = fcw_ref[ei * t:(ei + 1) * t, :]          # (T, S_out)
            d = dotf(he, we)
            acc = d if acc is None else acc + d
        o_ref[bi:bi + 1, :] = acc


# ----------------------------------------------------------------------------
# Wrapper
# ----------------------------------------------------------------------------
def toy_vit_forward(x, packed, *, cfg):
    """x: (B, 1, H, W) float32 — same semantics as ToyViT.forward."""
    B, S, E, F, H, NB = cfg["B"], cfg["S"], cfg["E"], cfg["F"], cfg["H"], cfg["NB"]
    tile_s, num_tiles = cfg["tile_s"], cfg["num_tiles"]
    S_out = S
    BT = B * tile_s

    input_shape = x.shape
    assert int(x.shape[0]) == B

    # host-side glue: flatten pixels, lay them out b-major within each S tile,
    # and stack them under the pre-tiled pos_embed rows (one streamed slab).
    x_bt = (x.reshape(B, S).astype(jnp.float32)
             .reshape(B, num_tiles, tile_s)
             .transpose(1, 0, 2)
             .reshape(num_tiles, 1, BT))
    tok = jnp.concatenate([packed["pos_bt"], x_bt], axis=1)     # (nt, E+1, BT)

    kernel = functools.partial(vit_fused_kernel, nb=NB, e=E, f=F, nh=H,
                               b=B, t=tile_s)

    partials = pl.pallas_call(
        kernel,
        out_shape=jax.ShapeDtypeStruct((num_tiles, B, S_out), jnp.float32),
        grid=(num_tiles,),
        in_specs=[
            pl.BlockSpec((None, E + 1, BT), lambda i: (i, 0, 0)),        # tok tile
            pl.BlockSpec((None, tile_s * E, S_out), lambda i: (i, 0, 0)),  # fc_w tile
            pl.BlockSpec(packed["g"].shape, lambda i: (0, 0)),           # globals
            pl.BlockSpec(packed["wm"].shape, lambda i: (0, 0, 0)),       # matrices
            pl.BlockSpec(packed["wv"].shape, lambda i: (0, 0, 0)),       # vectors
        ],
        # per-tile partial outputs: the S-tile axis is fully parallel (v7x can
        # shard it across both TensorCores); cross-tile sum + fc bias in XLA.
        out_specs=pl.BlockSpec((None, B, S_out), lambda i: (i, 0, 0)),
        compiler_params=pltpu.CompilerParams(
            dimension_semantics=("parallel",),
            vmem_limit_bytes=cfg["vmem_limit_bytes"]),
    )(tok, packed["fcw"], packed["g"], packed["wm"], packed["wv"])

    preds = jnp.sum(partials, axis=0) + packed["fc_b"][None, :]
    return preds.reshape(input_shape)


# ----------------------------------------------------------------------------
# Parameter init (torch-like shapes) + packing into consolidated arrays
# ----------------------------------------------------------------------------
def init_params(key, img_w, img_h, num_blocks=2, embed_dim=8, nhead=4,
                dim_feedforward=8):
    S = img_w * img_h
    E, H, F, NB = embed_dim, nhead, dim_feedforward, num_blocks
    state = {"key": key}

    def nrm(shape, s):
        state["key"], sub = jax.random.split(state["key"])
        return jax.random.normal(sub, shape, jnp.float32) * s

    s_e = 1.0 / math.sqrt(E)
    s_f = 1.0 / math.sqrt(F)
    blocks = []
    for _ in range(NB):
        blocks.append(dict(
            in_proj_w=nrm((3 * E, E), s_e), in_proj_b=nrm((3 * E,), 0.05),
            out_w=nrm((E, E), s_e), out_b=nrm((E,), 0.05),
            lin1_w=nrm((F, E), s_e), lin1_b=nrm((F,), 0.05),
            lin2_w=nrm((E, F), s_f), lin2_b=nrm((E,), 0.05),
            ln1_w=jnp.ones((E,), jnp.float32), ln1_b=jnp.zeros((E,), jnp.float32),
            ln2_w=jnp.ones((E,), jnp.float32), ln2_b=jnp.zeros((E,), jnp.float32)))

    return dict(
        pe_w=nrm((E, 1), 0.5), pe_b=nrm((E,), 0.1),
        # torch inits pos_embed to zeros; small random here to exercise the add
        pos=nrm((1, S, E), 0.02),
        blocks=blocks,
        fc_w=nrm((S, S * E), 1.0 / math.sqrt(S * E)),
        fc_b=nrm((S,), 0.05),
        cfg=dict(E=E, H=H, F=F, NB=NB, S=S))


def pack_params(p, batch_size, tile_s=None):
    """Fold + pack torch-shaped params into the kernel's consolidated arrays."""
    E, H, F, NB, S = (p["cfg"][k] for k in ("E", "H", "F", "NB", "S"))
    assert E % 8 == 0 and F % 8 == 0 and H <= 8 and E % H == 0
    B = batch_size
    Dh = E // H
    scale = 1.0 / math.sqrt(Dh)

    if tile_s is None:
        tile_s = 128 if (S > 128 and S % 128 == 0) else S
    assert S % tile_s == 0
    num_tiles = S // tile_s
    BT = B * tile_s

    # globals: pe_w column, 0/1 head reduce/expand matrices, LN moment matrix
    gl = _g_layout(E, H)
    g = jnp.zeros((gl["rows"], gl["width"]), jnp.float32)
    g = g.at[gl["pe"]:gl["pe"] + E, 0].set(p["pe_w"][:, 0])
    e_head = jnp.arange(E) // Dh
    hsum = (jnp.arange(H)[:, None] == e_head[None, :]).astype(jnp.float32)
    g = g.at[gl["hsum"]:gl["hsum"] + H, 0:E].set(hsum)
    g = g.at[gl["hexp"]:gl["hexp"] + E, 0:H].set(hsum.T)
    mom = jnp.zeros((2, 2 * E), jnp.float32)
    mom = mom.at[0, 0:E].set(1.0 / E).at[1, E:2 * E].set(1.0 / E)
    g = g.at[gl["mom"]:gl["mom"] + 2, 0:2 * E].set(mom)

    # per-block packs; attention scale folded into the q rows of in_proj
    ml = _wm_layout(E, F)
    vl = _wv_layout(E, F)
    wm = jnp.zeros((NB, ml["rows"], ml["width"]), jnp.float32)
    wv = jnp.zeros((NB, vl["rows"], 1), jnp.float32)
    for i, blk in enumerate(p["blocks"]):
        in_w = blk["in_proj_w"].at[0:E, :].multiply(scale)
        in_b = blk["in_proj_b"].at[0:E].multiply(scale)
        wm = wm.at[i, ml["qkv"]:ml["qkv"] + 3 * E, 0:E].set(in_w)
        wm = wm.at[i, ml["wo"]:ml["wo"] + E, 0:E].set(blk["out_w"])
        wm = wm.at[i, ml["w1"]:ml["w1"] + F, 0:E].set(blk["lin1_w"])
        wm = wm.at[i, ml["w2"]:ml["w2"] + E, 0:F].set(blk["lin2_w"])
        wv = wv.at[i, vl["bqkv"]:vl["bqkv"] + 3 * E, 0].set(in_b)
        wv = wv.at[i, vl["bo"]:vl["bo"] + E, 0].set(blk["out_b"])
        wv = wv.at[i, vl["b1"]:vl["b1"] + F, 0].set(blk["lin1_b"])
        wv = wv.at[i, vl["b2"]:vl["b2"] + E, 0].set(blk["lin2_b"])
        wv = wv.at[i, vl["ln1w"]:vl["ln1w"] + E, 0].set(blk["ln1_w"])
        wv = wv.at[i, vl["ln1b"]:vl["ln1b"] + E, 0].set(blk["ln1_b"])
        wv = wv.at[i, vl["ln2w"]:vl["ln2w"] + E, 0].set(blk["ln2_w"])
        wv = wv.at[i, vl["ln2b"]:vl["ln2b"] + E, 0].set(blk["ln2_b"])

    # pos_embed pre-tiled to the slab layout, patch_to_embedding bias folded in
    # pos_bt[t, e, b*tile_s + s] = pos[t*tile_s + s, e] + pe_b[e]
    pos_se = p["pos"][0] + p["pe_b"][None, :]                     # (S, E)
    pos_t = pos_se.T.reshape(E, num_tiles, tile_s).transpose(1, 0, 2)
    pos_bt = jnp.broadcast_to(pos_t[:, :, None, :],
                              (num_tiles, E, B, tile_s)).reshape(num_tiles, E, BT)

    # fc weight, streamed per tile in e-major row order (row = e*tile_s + s)
    # fcw[t, e*tile_s + s, o] = fc_w[o, (t*tile_s + s)*E + e]
    fcw = (p["fc_w"].T.reshape(num_tiles, tile_s, E, S)
                      .transpose(0, 2, 1, 3)
                      .reshape(num_tiles, tile_s * E, S))

    # VMEM budget: only the streamed fc_w tile really scales; set an explicit
    # scoped-VMEM limit so v5e's 16 MiB default / v7x's 64 MiB physical don't
    # surprise us if the toy is scaled up.
    streamed = 4 * (tile_s * E * S + (E + 1) * BT + B * S)        # per-tile slabs
    resident = 4 * (g.size + wm.size + wv.shape[0] * wv.shape[1] * 128)
    vmem_limit = int(min(max(4 * streamed + 2 * resident, 16 * 2**20), 64 * 2**20))

    packed = dict(g=g, wm=wm, wv=wv, pos_bt=pos_bt, fcw=fcw, fc_b=p["fc_b"])
    cfg = dict(B=B, S=S, E=E, H=H, F=F, NB=NB, tile_s=tile_s,
               num_tiles=num_tiles, vmem_limit_bytes=vmem_limit)
    return packed, cfg


if __name__ == "__main__":
    IMG_W, IMG_H = 8, 8          # img_size = 64
    B = 2                        # B * img_size = 128 -> one vreg-wide slab

    key = jax.random.PRNGKey(0)
    kx, kp = jax.random.split(key)
    x = jax.random.normal(kx, (B, 1, IMG_H, IMG_W), jnp.float32)

    params = init_params(kp, IMG_W, IMG_H, num_blocks=2, embed_dim=8,
                         nhead=4, dim_feedforward=8)
    packed, cfg = pack_params(params, batch_size=B)

    fwd = jax.jit(functools.partial(toy_vit_forward, cfg=cfg))
    out = jax.block_until_ready(fwd(x, packed))

    assert out.shape == x.shape, (out.shape, x.shape)
    assert bool(jnp.all(jnp.isfinite(out)))
    print("KERNEL_OK")
</pallas_src>

<mosaic_0001>
module attributes {stable_mosaic.version = 11 : i64} {
  func.func @vit_fused_kernel(%arg0: i32, %arg1: memref<1x9x128xf32, #tpu.memory_space<vmem>>, %arg2: memref<1x512x64xf32, #tpu.memory_space<vmem>>, %arg3: memref<32x16xf32, #tpu.memory_space<vmem>>, %arg4: memref<2x48x8xf32, #tpu.memory_space<vmem>>, %arg5: memref<2x80x1xf32, #tpu.memory_space<vmem>>, %arg6: memref<1x2x64xf32, #tpu.memory_space<vmem>>) attributes {dimension_semantics = [#tpu.dimension_semantics<parallel>], iteration_bounds = array<i64: 1>, scalar_prefetch = 0 : i64, scratch_operands = 0 : i64, tpu.core_type = #tpu.core_type<tc>, window_params = [{transform_indices = @transform_0, window_bounds = array<i64: 1, 9, 128>}, {transform_indices = @transform_1, window_bounds = array<i64: 1, 512, 64>}, {pipeline_mode = #tpu.pipeline_mode<synchronous>, transform_indices = @transform_2, window_bounds = array<i64: 32, 16>}, {pipeline_mode = #tpu.pipeline_mode<synchronous>, transform_indices = @transform_3, window_bounds = array<i64: 2, 48, 8>}, {pipeline_mode = #tpu.pipeline_mode<synchronous>, transform_indices = @transform_4, window_bounds = array<i64: 2, 80, 1>}, {transform_indices = @transform_5, window_bounds = array<i64: 1, 2, 64>}]} {
    %c0 = arith.constant 0 : index
    %c0_0 = arith.constant 0 : index
    %0 = vector.load %arg3[%c0, %c0_0] : memref<32x16xf32, #tpu.memory_space<vmem>>, vector<8x1xf32>
    %c8 = arith.constant 8 : index
    %c0_1 = arith.constant 0 : index
    %1 = vector.load %arg3[%c8, %c0_1] : memref<32x16xf32, #tpu.memory_space<vmem>>, vector<4x8xf32>
    %c16 = arith.constant 16 : index
    %c0_2 = arith.constant 0 : index
    %2 = vector.load %arg3[%c16, %c0_2] : memref<32x16xf32, #tpu.memory_space<vmem>>, vector<8x4xf32>
    %c24 = arith.constant 24 : index
    %c0_3 = arith.constant 0 : index
    %3 = vector.load %arg3[%c24, %c0_3] : memref<32x16xf32, #tpu.memory_space<vmem>>, vector<2x16xf32>
    %c0_4 = arith.constant 0 : index
    %c0_5 = arith.constant 0 : index
    %c0_6 = arith.constant 0 : index
    %4 = vector.load %arg1[%c0_4, %c0_5, %c0_6] : memref<1x9x128xf32, #tpu.memory_space<vmem>>, vector<1x8x128xf32>
    %5 = vector.shape_cast %4 : vector<1x8x128xf32> to vector<8x128xf32>
    %c0_7 = arith.constant 0 : index
    %c8_8 = arith.constant 8 : index
    %c0_9 = arith.constant 0 : index
    %6 = vector.load %arg1[%c0_7, %c8_8, %c0_9] : memref<1x9x128xf32, #tpu.memory_space<vmem>>, vector<1x1x128xf32>
    %7 = vector.shape_cast %6 : vector<1x1x128xf32> to vector<1x128xf32>
    %8 = vector.broadcast %0 : vector<8x1xf32> to vector<8x128xf32>
    %9 = vector.broadcast %7 : vector<1x128xf32> to vector<8x128xf32>
    %10 = arith.mulf %8, %9 : vector<8x128xf32>
    %11 = arith.addf %10, %5 : vector<8x128xf32>
    %c0_10 = arith.constant 0 : index
    %c0_11 = arith.constant 0 : index
    %c0_12 = arith.constant 0 : index
    %12 = vector.load %arg4[%c0_10, %c0_11, %c0_12] : memref<2x48x8xf32, #tpu.memory_space<vmem>>, vector<1x24x8xf32>
    %13 = vector.shape_cast %12 : vector<1x24x8xf32> to vector<24x8xf32>
    %c0_13 = arith.constant 0 : index
    %c0_14 = arith.constant 0 : index
    %c0_15 = arith.constant 0 : index
    %14 = vector.load %arg5[%c0_13, %c0_14, %c0_15] : memref<2x80x1xf32, #tpu.memory_space<vmem>>, vector<1x24x1xf32>
    %15 = vector.shape_cast %14 : vector<1x24x1xf32> to vector<24x1xf32>
    %cst = arith.constant dense<0.000000e+00> : vector<24x128xf32>
    %16 = tpu.matmul %13, %11, %cst {dimension_numbers = #tpu.dot_dimension_numbers<[1], [0], [0], [1], [0, 0, 1, 1], [], []>} : vector<24x8xf32>, vector<8x128xf32>, vector<24x128xf32> -> vector<24x128xf32>
    %17 = vector.broadcast %15 : vector<24x1xf32> to vector<24x128xf32>
    %18 = arith.addf %16, %17 : vector<24x128xf32>
    %19 = vector.extract_strided_slice %18 {offsets = [0, 0], sizes = [8, 128], strides = [1, 1]} : vector<24x128xf32> to vector<8x128xf32>
    %20 = vector.extract_strided_slice %18 {offsets = [8, 0], sizes = [8, 128], strides = [1, 1]} : vector<24x128xf32> to vector<8x128xf32>
    %21 = vector.extract_strided_slice %18 {offsets = [16, 0], sizes = [8, 128], strides = [1, 1]} : vector<24x128xf32> to vector<8x128xf32>
    %22 = arith.mulf %19, %20 : vector<8x128xf32>
    %cst_16 = arith.constant dense<0.000000e+00> : vector<4x128xf32>
    %23 = tpu.matmul %1, %22, %cst_16 {dimension_numbers = #tpu.dot_dimension_numbers<[1], [0], [0], [1], [0, 0, 1, 1], [], []>} : vector<4x8xf32>, vector<8x128xf32>, vector<4x128xf32> -> vector<4x128xf32>
    %c64_i32 = arith.constant 64 : i32
    %24 = tpu.dynamic_rotate %20 by %c64_i32 dim 1 : vector<8x128xf32>, i32 -> vector<8x128xf32>
    %c64_i32_17 = arith.constant 64 : i32
    %25 = tpu.dynamic_rotate %21 by %c64_i32_17 dim 1 : vector<8x128xf32>, i32 -> vector<8x128xf32>
    %26 = arith.mulf %19, %24 : vector<8x128xf32>
    %cst_18 = arith.constant dense<0.000000e+00> : vector<4x128xf32>
    %27 = tpu.matmul %1, %26, %cst_18 {dimension_numbers = #tpu.dot_dimension_numbers<[1], [0], [0], [1], [0, 0, 1, 1], [], []>} : vector<4x8xf32>, vector<8x128xf32>, vector<4x128xf32> -> vector<4x128xf32>
    %28 = arith.maximumf %23, %27 : vector<4x128xf32>
    %29 = arith.subf %23, %28 : vector<4x128xf32>
    %30 = math.exp %29 : vector<4x128xf32>
    %cst_19 = arith.constant dense<0.000000e+00> : vector<8x128xf32>
    %31 = tpu.matmul %2, %30, %cst_19 {dimension_numbers = #tpu.dot_dimension_numbers<[1], [0], [0], [1], [0, 0, 1, 1], [], []>} : vector<8x4xf32>, vector<4x128xf32>, vector<8x128xf32> -> vector<8x128xf32>
    %32 = arith.mulf %31, %21 : vector<8x128xf32>
    %33 = arith.subf %27, %28 : vector<4x128xf32>
    %34 = math.exp %33 : vector<4x128xf32>
    %35 = arith.addf %30, %34 : vector<4x128xf32>
    %cst_20 = arith.constant dense<0.000000e+00> : vector<8x128xf32>
    %36 = tpu.matmul %2, %34, %cst_20 {dimension_numbers = #tpu.dot_dimension_numbers<[1], [0], [0], [1], [0, 0, 1, 1], [], []>} : vector<8x4xf32>, vector<4x128xf32>, vector<8x128xf32> -> vector<8x128xf32>
    %37 = arith.mulf %36, %25 : vector<8x128xf32>
    %38 = arith.addf %32, %37 : vector<8x128xf32>
    %39 = tpu.reciprocal %35 {approx = true} : vector<4x128xf32> -> vector<4x128xf32>
    %cst_21 = arith.constant dense<0.000000e+00> : vector<8x128xf32>
    %40 = tpu.matmul %2, %39, %cst_21 {dimension_numbers = #tpu.dot_dimension_numbers<[1], [0], [0], [1], [0, 0, 1, 1], [], []>} : vector<8x4xf32>, vector<4x128xf32>, vector<8x128xf32> -> vector<8x128xf32>
    %41 = arith.mulf %38, %40 : vector<8x128xf32>
    %c0_22 = arith.constant 0 : index
    %c24_23 = arith.constant 24 : index
    %c0_24 = arith.constant 0 : index
    %42 = vector.load %arg4[%c0_22, %c24_23, %c0_24] : memref<2x48x8xf32, #tpu.memory_space<vmem>>, vector<1x8x8xf32>
    %43 = vector.shape_cast %42 : vector<1x8x8xf32> to vector<8x8xf32>
    %c0_25 = arith.constant 0 : index
    %c24_26 = arith.constant 24 : index
    %c0_27 = arith.constant 0 : index
    %44 = vector.load %arg5[%c0_25, %c24_26, %c0_27] : memref<2x80x1xf32, #tpu.memory_space<vmem>>, vector<1x8x1xf32>
    %45 = vector.shape_cast %44 : vector<1x8x1xf32> to vector<8x1xf32>
    %cst_28 = arith.constant dense<0.000000e+00> : vector<8x128xf32>
    %46 = tpu.matmul %43, %41, %cst_28 {dimension_numbers = #tpu.dot_dimension_numbers<[1], [0], [0], [1], [0, 0, 1, 1], [], []>} : vector<8x8xf32>, vector<8x128xf32>, vector<8x128xf32> -> vector<8x128xf32>
    %47 = vector.broadcast %45 : vector<8x1xf32> to vector<8x128xf32>
    %48 = arith.addf %46, %47 : vector<8x128xf32>
    %c0_29 = arith.constant 0 : index
    %c48 = arith.constant 48 : index
    %c0_30 = arith.constant 0 : index
    %49 = vector.load %arg5[%c0_29, %c48, %c0_30] : memref<2x80x1xf32, #tpu.memory_space<vmem>>, vector<1x8x1xf32>
    %50 = vector.shape_cast %49 : vector<1x8x1xf32> to vector<8x1xf32>
    %c0_31 = arith.constant 0 : index
    %c56 = arith.constant 56 : index
    %c0_32 = arith.constant 0 : index
    %51 = vector.load %arg5[%c0_31, %c56, %c0_32] : memref<2x80x1xf32, #tpu.memory_space<vmem>>, vector<1x8x1xf32>
    %52 = vector.shape_cast %51 : vector<1x8x1xf32> to vector<8x1xf32>
    %53 = arith.addf %11, %48 : vector<8x128xf32>
    %54 = arith.mulf %53, %53 : vector<8x128xf32>
    %55 = tpu.concatenate %53, %54 in 0 : vector<8x128xf32>, vector<8x128xf32> -> vector<16x128xf32>
    %cst_33 = arith.constant dense<0.000000e+00> : vector<2x128xf32>
    %56 = tpu.matmul %3, %55, %cst_33 {dimension_numbers = #tpu.dot_dimension_numbers<[1], [0], [0], [1], [0, 0, 1, 1], [], []>} : vector<2x16xf32>, vector<16x128xf32>, vector<2x128xf32> -> vector<2x128xf32>
    %57 = vector.extract_strided_slice %56 {offsets = [0, 0], sizes = [1, 128], strides = [1, 1]} : vector<2x128xf32> to vector<1x128xf32>
    %58 = vector.extract_strided_slice %56 {offsets = [1, 0], sizes = [1, 128], strides = [1, 1]} : vector<2x128xf32> to vector<1x128xf32>
    %59 = arith.mulf %57, %57 : vector<1x128xf32>
    %60 = arith.subf %58, %59 : vector<1x128xf32>
    %61 = vector.broadcast %57 : vector<1x128xf32> to vector<8x128xf32>
    %62 = arith.subf %53, %61 : vector<8x128xf32>
    %cst_34 = arith.constant 9.99999974E-6 : f32
    %63 = vector.broadcast %cst_34 : f32 to vector<1x128xf32>
    %64 = arith.addf %60, %63 : vector<1x128xf32>
    %65 = math.rsqrt %64 : vector<1x128xf32>
    %66 = vector.broadcast %65 : vector<1x128xf32> to vector<8x128xf32>
    %67 = arith.mulf %62, %66 : vector<8x128xf32>
    %68 = vector.broadcast %50 : vector<8x1xf32> to vector<8x128xf32>
    %69 = arith.mulf %67, %68 : vector<8x128xf32>
    %70 = vector.broadcast %52 : vector<8x1xf32> to vector<8x128xf32>
    %71 = arith.addf %69, %70 : vector<8x128xf32>
    %c0_35 = arith.constant 0 : index
    %c32 = arith.constant 32 : index
    %c0_36 = arith.constant 0 : index
    %72 = vector.load %arg4[%c0_35, %c32, %c0_36] : memref<2x48x8xf32, #tpu.memory_space<vmem>>, vector<1x8x8xf32>
    %73 = vector.shape_cast %72 : vector<1x8x8xf32> to vector<8x8xf32>
    %c0_37 = arith.constant 0 : index
    %c32_38 = arith.constant 32 : index
    %c0_39 = arith.constant 0 : index
    %74 = vector.load %arg5[%c0_37, %c32_38, %c0_39] : memref<2x80x1xf32, #tpu.memory_space<vmem>>, vector<1x8x1xf32>
    %75 = vector.shape_cast %74 : vector<1x8x1xf32> to vector<8x1xf32>
    %c0_40 = arith.constant 0 : index
    %c40 = arith.constant 40 : index
    %c0_41 = arith.constant 0 : index
    %76 = vector.load %arg4[%c0_40, %c40, %c0_41] : memref<2x48x8xf32, #tpu.memory_space<vmem>>, vector<1x8x8xf32>
    %77 = vector.shape_cast %76 : vector<1x8x8xf32> to vector<8x8xf32>
    %c0_42 = arith.constant 0 : index
    %c40_43 = arith.constant 40 : index
    %c0_44 = arith.constant 0 : index
    %78 = vector.load %arg5[%c0_42, %c40_43, %c0_44] : memref<2x80x1xf32, #tpu.memory_space<vmem>>, vector<1x8x1xf32>
    %79 = vector.shape_cast %78 : vector<1x8x1xf32> to vector<8x1xf32>
    %cst_45 = arith.constant dense<0.000000e+00> : vector<8x128xf32>
    %80 = tpu.matmul %73, %71, %cst_45 {dimension_numbers = #tpu.dot_dimension_numbers<[1], [0], [0], [1], [0, 0, 1, 1], [], []>} : vector<8x8xf32>, vector<8x128xf32>, vector<8x128xf32> -> vector<8x128xf32>
    %81 = vector.broadcast %75 : vector<8x1xf32> to vector<8x128xf32>
    %82 = arith.addf %80, %81 : vector<8x128xf32>
    %cst_46 = arith.constant 0.000000e+00 : f32
    %83 = vector.broadcast %cst_46 : f32 to vector<8x128xf32>
    %84 = arith.maximumf %82, %83 : vector<8x128xf32>
    %cst_47 = arith.constant dense<0.000000e+00> : vector<8x128xf32>
    %85 = tpu.matmul %77, %84, %cst_47 {dimension_numbers = #tpu.dot_dimension_numbers<[1], [0], [0], [1], [0, 0, 1, 1], [], []>} : vector<8x8xf32>, vector<8x128xf32>, vector<8x128xf32> -> vector<8x128xf32>
    %86 = vector.broadcast %79 : vector<8x1xf32> to vector<8x128xf32>
    %87 = arith.addf %85, %86 : vector<8x128xf32>
    %c0_48 = arith.constant 0 : index
    %c64 = arith.constant 64 : index
    %c0_49 = arith.constant 0 : index
    %88 = vector.load %arg5[%c0_48, %c64, %c0_49] : memref<2x80x1xf32, #tpu.memory_space<vmem>>, vector<1x8x1xf32>
    %89 = vector.shape_cast %88 : vector<1x8x1xf32> to vector<8x1xf32>
    %c0_50 = arith.constant 0 : index
    %c72 = arith.constant 72 : index
    %c0_51 = arith.constant 0 : index
    %90 = vector.load %arg5[%c0_50, %c72, %c0_51] : memref<2x80x1xf32, #tpu.memory_space<vmem>>, vector<1x8x1xf32>
    %91 = vector.shape_cast %90 : vector<1x8x1xf32> to vector<8x1xf32>
    %92 = arith.addf %71, %87 : vector<8x128xf32>
    %93 = arith.mulf %92, %92 : vector<8x128xf32>
    %94 = tpu.concatenate %92, %93 in 0 : vector<8x128xf32>, vector<8x128xf32> -> vector<16x128xf32>
    %cst_52 = arith.constant dense<0.000000e+00> : vector<2x128xf32>
    %95 = tpu.matmul %3, %94, %cst_52 {dimension_numbers = #tpu.dot_dimension_numbers<[1], [0], [0], [1], [0, 0, 1, 1], [], []>} : vector<2x16xf32>, vector<16x128xf32>, vector<2x128xf32> -> vector<2x128xf32>
    %96 = vector.extract_strided_slice %95 {offsets = [0, 0], sizes = [1, 128], strides = [1, 1]} : vector<2x128xf32> to vector<1x128xf32>
    %97 = vector.extract_strided_slice %95 {offsets = [1, 0], sizes = [1, 128], strides = [1, 1]} : vector<2x128xf32> to vector<1x128xf32>
    %98 = arith.mulf %96, %96 : vector<1x128xf32>
    %99 = arith.subf %97, %98 : vector<1x128xf32>
    %100 = vector.broadcast %96 : vector<1x128xf32> to vector<8x128xf32>
    %101 = arith.subf %92, %100 : vector<8x128xf32>
    %cst_53 = arith.constant 9.99999974E-6 : f32
    %102 = vector.broadcast %cst_53 : f32 to vector<1x128xf32>
    %103 = arith.addf %99, %102 : vector<1x128xf32>
    %104 = math.rsqrt %103 : vector<1x128xf32>
    %105 = vector.broadcast %104 : vector<1x128xf32> to vector<8x128xf32>
    %106 = arith.mulf %101, %105 : vector<8x128xf32>
    %107 = vector.broadcast %89 : vector<8x1xf32> to vector<8x128xf32>
    %108 = arith.mulf %106, %107 : vector<8x128xf32>
    %109 = vector.broadcast %91 : vector<8x1xf32> to vector<8x128xf32>
    %110 = arith.addf %108, %109 : vector<8x128xf32>
    %c1 = arith.constant 1 : index
    %c0_54 = arith.constant 0 : index
    %c0_55 = arith.constant 0 : index
    %111 = vector.load %arg4[%c1, %c0_54, %c0_55] : memref<2x48x8xf32, #tpu.memory_space<vmem>>, vector<1x24x8xf32>
    %112 = vector.shape_cast %111 : vector<1x24x8xf32> to vector<24x8xf32>
    %c1_56 = arith.constant 1 : index
    %c0_57 = arith.constant 0 : index
    %c0_58 = arith.constant 0 : index
    %113 = vector.load %arg5[%c1_56, %c0_57, %c0_58] : memref<2x80x1xf32, #tpu.memory_space<vmem>>, vector<1x24x1xf32>
    %114 = vector.shape_cast %113 : vector<1x24x1xf32> to vector<24x1xf32>
    %cst_59 = arith.constant dense<0.000000e+00> : vector<24x128xf32>
    %115 = tpu.matmul %112, %110, %cst_59 {dimension_numbers = #tpu.dot_dimension_numbers<[1], [0], [0], [1], [0, 0, 1, 1], [], []>} : vector<24x8xf32>, vector<8x128xf32>, vector<24x128xf32> -> vector<24x128xf32>
    %116 = vector.broadcast %114 : vector<24x1xf32> to vector<24x128xf32>
    %117 = arith.addf %115, %116 : vector<24x128xf32>
    %118 = vector.extract_strided_slice %117 {offsets = [0, 0], sizes = [8, 128], strides = [1, 1]} : vector<24x128xf32> to vector<8x128xf32>
    %119 = vector.extract_strided_slice %117 {offsets = [8, 0], sizes = [8, 128], strides = [1, 1]} : vector<24x128xf32> to vector<8x128xf32>
    %120 = vector.extract_strided_slice %117 {offsets = [16, 0], sizes = [8, 128], strides = [1, 1]} : vector<24x128xf32> to vector<8x128xf32>
    %121 = arith.mulf %118, %119 : vector<8x128xf32>
    %cst_60 = arith.constant dense<0.000000e+00> : vector<4x128xf32>
    %122 = tpu.matmul %1, %121, %cst_60 {dimension_numbers = #tpu.dot_dimension_numbers<[1], [0], [0], [1], [0, 0, 1, 1], [], []>} : vector<4x8xf32>, vector<8x128xf32>, vector<4x128xf32> -> vector<4x128xf32>
    %c64_i32_61 = arith.constant 64 : i32
    %123 = tpu.dynamic_rotate %119 by %c64_i32_61 dim 1 : vector<8x128xf32>, i32 -> vector<8x128xf32>
    %c64_i32_62 = arith.constant 64 : i32
    %124 = tpu.dynamic_rotate %120 by %c64_i32_62 dim 1 : vector<8x128xf32>, i32 -> vector<8x128xf32>
    %125 = arith.mulf %118, %123 : vector<8x128xf32>
    %cst_63 = arith.constant dense<0.000000e+00> : vector<4x128xf32>
    %126 = tpu.matmul %1, %125, %cst_63 {dimension_numbers = #tpu.dot_dimension_numbers<[1], [0], [0], [1], [0, 0, 1, 1], [], []>} : vector<4x8xf32>, vector<8x128xf32>, vector<4x128xf32> -> vector<4x128xf32>
    %127 = arith.maximumf %122, %126 : vector<4x128xf32>
    %128 = arith.subf %122, %127 : vector<4x128xf32>
    %129 = math.exp %128 : vector<4x128xf32>
    %cst_64 = arith.constant dense<0.000000e+00> : vector<8x128xf32>
    %130 = tpu.matmul %2, %129, %cst_64 {dimension_numbers = #tpu.dot_dimension_numbers<[1], [0], [0], [1], [0, 0, 1, 1], [], []>} : vector<8x4xf32>, vector<4x128xf32>, vector<8x128xf32> -> vector<8x128xf32>
    %131 = arith.mulf %130, %120 : vector<8x128xf32>
    %132 = arith.subf %126, %127 : vector<4x128xf32>
    %133 = math.exp %132 : vector<4x128xf32>
    %134 = arith.addf %129, %133 : vector<4x128xf32>
    %cst_65 = arith.constant dense<0.000000e+00> : vector<8x128xf32>
    %135 = tpu.matmul %2, %133, %cst_65 {dimension_numbers = #tpu.dot_dimension_numbers<[1], [0], [0], [1], [0, 0, 1, 1], [], []>} : vector<8x4xf32>, vector<4x128xf32>, vector<8x128xf32> -> vector<8x128xf32>
    %136 = arith.mulf %135, %124 : vector<8x128xf32>
    %137 = arith.addf %131, %136 : vector<8x128xf32>
    %138 = tpu.reciprocal %134 {approx = true} : vector<4x128xf32> -> vector<4x128xf32>
    %cst_66 = arith.constant dense<0.000000e+00> : vector<8x128xf32>
    %139 = tpu.matmul %2, %138, %cst_66 {dimension_numbers = #tpu.dot_dimension_numbers<[1], [0], [0], [1], [0, 0, 1, 1], [], []>} : vector<8x4xf32>, vector<4x128xf32>, vector<8x128xf32> -> vector<8x128xf32>
    %140 = arith.mulf %137, %139 : vector<8x128xf32>
    %c1_67 = arith.constant 1 : index
    %c24_68 = arith.constant 24 : index
    %c0_69 = arith.constant 0 : index
    %141 = vector.load %arg4[%c1_67, %c24_68, %c0_69] : memref<2x48x8xf32, #tpu.memory_space<vmem>>, vector<1x8x8xf32>
    %142 = vector.shape_cast %141 : vector<1x8x8xf32> to vector<8x8xf32>
    %c1_70 = arith.constant 1 : index
    %c24_71 = arith.constant 24 : index
    %c0_72 = arith.constant 0 : index
    %143 = vector.load %arg5[%c1_70, %c24_71, %c0_72] : memref<2x80x1xf32, #tpu.memory_space<vmem>>, vector<1x8x1xf32>
    %144 = vector.shape_cast %143 : vector<1x8x1xf32> to vector<8x1xf32>
    %cst_73 = arith.constant dense<0.000000e+00> : vector<8x128xf32>
    %145 = tpu.matmul %142, %140, %cst_73 {dimension_numbers = #tpu.dot_dimension_numbers<[1], [0], [0], [1], [0, 0, 1, 1], [], []>} : vector<8x8xf32>, vector<8x128xf32>, vector<8x128xf32> -> vector<8x128xf32>
    %146 = vector.broadcast %144 : vector<8x1xf32> to vector<8x128xf32>
    %147 = arith.addf %145, %146 : vector<8x128xf32>
    %c1_74 = arith.constant 1 : index
    %c48_75 = arith.constant 48 : index
    %c0_76 = arith.constant 0 : index
    %148 = vector.load %arg5[%c1_74, %c48_75, %c0_76] : memref<2x80x1xf32, #tpu.memory_space<vmem>>, vector<1x8x1xf32>
    %149 = vector.shape_cast %148 : vector<1x8x1xf32> to vector<8x1xf32>
    %c1_77 = arith.constant 1 : index
    %c56_78 = arith.constant 56 : index
    %c0_79 = arith.constant 0 : index
    %150 = vector.load %arg5[%c1_77, %c56_78, %c0_79] : memref<2x80x1xf32, #tpu.memory_space<vmem>>, vector<1x8x1xf32>
    %151 = vector.shape_cast %150 : vector<1x8x1xf32> to vector<8x1xf32>
    %152 = arith.addf %110, %147 : vector<8x128xf32>
    %153 = arith.mulf %152, %152 : vector<8x128xf32>
    %154 = tpu.concatenate %152, %153 in 0 : vector<8x128xf32>, vector<8x128xf32> -> vector<16x128xf32>
    %cst_80 = arith.constant dense<0.000000e+00> : vector<2x128xf32>
    %155 = tpu.matmul %3, %154, %cst_80 {dimension_numbers = #tpu.dot_dimension_numbers<[1], [0], [0], [1], [0, 0, 1, 1], [], []>} : vector<2x16xf32>, vector<16x128xf32>, vector<2x128xf32> -> vector<2x128xf32>
    %156 = vector.extract_strided_slice %155 {offsets = [0, 0], sizes = [1, 128], strides = [1, 1]} : vector<2x128xf32> to vector<1x128xf32>
    %157 = vector.extract_strided_slice %155 {offsets = [1, 0], sizes = [1, 128], strides = [1, 1]} : vector<2x128xf32> to vector<1x128xf32>
    %158 = arith.mulf %156, %156 : vector<1x128xf32>
    %159 = arith.subf %157, %158 : vector<1x128xf32>
    %160 = vector.broadcast %156 : vector<1x128xf32> to vector<8x128xf32>
    %161 = arith.subf %152, %160 : vector<8x128xf32>
    %cst_81 = arith.constant 9.99999974E-6 : f32
    %162 = vector.broadcast %cst_81 : f32 to vector<1x128xf32>
    %163 = arith.addf %159, %162 : vector<1x128xf32>
    %164 = math.rsqrt %163 : vector<1x128xf32>
    %165 = vector.broadcast %164 : vector<1x128xf32> to vector<8x128xf32>
    %166 = arith.mulf %161, %165 : vector<8x128xf32>
    %167 = vector.broadcast %149 : vector<8x1xf32> to vector<8x128xf32>
    %168 = arith.mulf %166, %167 : vector<8x128xf32>
    %169 = vector.broadcast %151 : vector<8x1xf32> to vector<8x128xf32>
    %170 = arith.addf %168, %169 : vector<8x128xf32>
    %c1_82 = arith.constant 1 : index
    %c32_83 = arith.constant 32 : index
    %c0_84 = arith.constant 0 : index
    %171 = vector.load %arg4[%c1_82, %c32_83, %c0_84] : memref<2x48x8xf32, #tpu.memory_space<vmem>>, vector<1x8x8xf32>
    %172 = vector.shape_cast %171 : vector<1x8x8xf32> to vector<8x8xf32>
    %c1_85 = arith.constant 1 : index
    %c32_86 = arith.constant 32 : index
    %c0_87 = arith.constant 0 : index
    %173 = vector.load %arg5[%c1_85, %c32_86, %c0_87] : memref<2x80x1xf32, #tpu.memory_space<vmem>>, vector<1x8x1xf32>
    %174 = vector.shape_cast %173 : vector<1x8x1xf32> to vector<8x1xf32>
    %c1_88 = arith.constant 1 : index
    %c40_89 = arith.constant 40 : index
    %c0_90 = arith.constant 0 : index
    %175 = vector.load %arg4[%c1_88, %c40_89, %c0_90] : memref<2x48x8xf32, #tpu.memory_space<vmem>>, vector<1x8x8xf32>
    %176 = vector.shape_cast %175 : vector<1x8x8xf32> to vector<8x8xf32>
    %c1_91 = arith.constant 1 : index
    %c40_92 = arith.constant 40 : index
    %c0_93 = arith.constant 0 : index
    %177 = vector.load %arg5[%c1_91, %c40_92, %c0_93] : memref<2x80x1xf32, #tpu.memory_space<vmem>>, vector<1x8x1xf32>
    %178 = vector.shape_cast %177 : vector<1x8x1xf32> to vector<8x1xf32>
    %cst_94 = arith.constant dense<0.000000e+00> : vector<8x128xf32>
    %179 = tpu.matmul %172, %170, %cst_94 {dimension_numbers = #tpu.dot_dimension_numbers<[1], [0], [0], [1], [0, 0, 1, 1], [], []>} : vector<8x8xf32>, vector<8x128xf32>, vector<8x128xf32> -> vector<8x128xf32>
    %180 = vector.broadcast %174 : vector<8x1xf32> to vector<8x128xf32>
    %181 = arith.addf %179, %180 : vector<8x128xf32>
    %cst_95 = arith.constant 0.000000e+00 : f32
    %182 = vector.broadcast %cst_95 : f32 to vector<8x128xf32>
    %183 = arith.maximumf %181, %182 : vector<8x128xf32>
    %cst_96 = arith.constant dense<0.000000e+00> : vector<8x128xf32>
    %184 = tpu.matmul %176, %183, %cst_96 {dimension_numbers = #tpu.dot_dimension_numbers<[1], [0], [0], [1], [0, 0, 1, 1], [], []>} : vector<8x8xf32>, vector<8x128xf32>, vector<8x128xf32> -> vector<8x128xf32>
    %185 = vector.broadcast %178 : vector<8x1xf32> to vector<8x128xf32>
    %186 = arith.addf %184, %185 : vector<8x128xf32>
    %c1_97 = arith.constant 1 : index
    %c64_98 = arith.constant 64 : index
    %c0_99 = arith.constant 0 : index
    %187 = vector.load %arg5[%c1_97, %c64_98, %c0_99] : memref<2x80x1xf32, #tpu.memory_space<vmem>>, vector<1x8x1xf32>
    %188 = vector.shape_cast %187 : vector<1x8x1xf32> to vector<8x1xf32>
    %c1_100 = arith.constant 1 : index
    %c72_101 = arith.constant 72 : index
    %c0_102 = arith.constant 0 : index
    %189 = vector.load %arg5[%c1_100, %c72_101, %c0_102] : memref<2x80x1xf32, #tpu.memory_space<vmem>>, vector<1x8x1xf32>
    %190 = vector.shape_cast %189 : vector<1x8x1xf32> to vector<8x1xf32>
    %191 = arith.addf %170, %186 : vector<8x128xf32>
    %192 = arith.mulf %191, %191 : vector<8x128xf32>
    %193 = tpu.concatenate %191, %192 in 0 : vector<8x128xf32>, vector<8x128xf32> -> vector<16x128xf32>
    %cst_103 = arith.constant dense<0.000000e+00> : vector<2x128xf32>
    %194 = tpu.matmul %3, %193, %cst_103 {dimension_numbers = #tpu.dot_dimension_numbers<[1], [0], [0], [1], [0, 0, 1, 1], [], []>} : vector<2x16xf32>, vector<16x128xf32>, vector<2x128xf32> -> vector<2x128xf32>
    %195 = vector.extract_strided_slice %194 {offsets = [0, 0], sizes = [1, 128], strides = [1, 1]} : vector<2x128xf32> to vector<1x128xf32>
    %196 = vector.extract_strided_slice %194 {offsets = [1, 0], sizes = [1, 128], strides = [1, 1]} : vector<2x128xf32> to vector<1x128xf32>
    %197 = arith.mulf %195, %195 : vector<1x128xf32>
    %198 = arith.subf %196, %197 : vector<1x128xf32>
    %199 = vector.broadcast %195 : vector<1x128xf32> to vector<8x128xf32>
    %200 = arith.subf %191, %199 : vector<8x128xf32>
    %cst_104 = arith.constant 9.99999974E-6 : f32
    %201 = vector.broadcast %cst_104 : f32 to vector<1x128xf32>
    %202 = arith.addf %198, %201 : vector<1x128xf32>
    %203 = math.rsqrt %202 : vector<1x128xf32>
    %204 = vector.broadcast %203 : vector<1x128xf32> to vector<8x128xf32>
    %205 = arith.mulf %200, %204 : vector<8x128xf32>
    %206 = vector.broadcast %188 : vector<8x1xf32> to vector<8x128xf32>
    %207 = arith.mulf %205, %206 : vector<8x128xf32>
    %208 = vector.broadcast %190 : vector<8x1xf32> to vector<8x128xf32>
    %209 = arith.addf %207, %208 : vector<8x128xf32>
    %210 = vector.extract_strided_slice %209 {offsets = [0, 0], sizes = [1, 64], strides = [1, 1]} : vector<8x128xf32> to vector<1x64xf32>
    %c0_105 = arith.constant 0 : index
    %c0_106 = arith.constant 0 : index
    %c0_107 = arith.constant 0 : index
    %211 = vector.load %arg2[%c0_105, %c0_106, %c0_107] : memref<1x512x64xf32, #tpu.memory_space<vmem>>, vector<1x64x64xf32>
    %212 = vector.shape_cast %211 : vector<1x64x64xf32> to vector<64x64xf32>
    %cst_108 = arith.constant dense<0.000000e+00> : vector<1x64xf32>
    %213 = tpu.matmul %210, %212, %cst_108 {dimension_numbers = #tpu.dot_dimension_numbers<[1], [0], [0], [1], [0, 0, 1, 1], [], []>} : vector<1x64xf32>, vector<64x64xf32>, vector<1x64xf32> -> vector<1x64xf32>
    %214 = vector.extract_strided_slice %209 {offsets = [1, 0], sizes = [1, 64], strides = [1, 1]} : vector<8x128xf32> to vector<1x64xf32>
    %c0_109 = arith.constant 0 : index
    %c64_110 = arith.constant 64 : index
    %c0_111 = arith.constant 0 : index
    %215 = vector.load %arg2[%c0_109, %c64_110, %c0_111] : memref<1x512x64xf32, #tpu.memory_space<vmem>>, vector<1x64x64xf32>
    %216 = vector.shape_cast %215 : vector<1x64x64xf32> to vector<64x64xf32>
    %cst_112 = arith.constant dense<0.000000e+00> : vector<1x64xf32>
    %217 = tpu.matmul %214, %216, %cst_112 {dimension_numbers = #tpu.dot_dimension_numbers<[1], [0], [0], [1], [0, 0, 1, 1], [], []>} : vector<1x64xf32>, vector<64x64xf32>, vector<1x64xf32> -> vector<1x64xf32>
    %218 = arith.addf %213, %217 : vector<1x64xf32>
    %219 = vector.extract_strided_slice %209 {offsets = [2, 0], sizes = [1, 64], strides = [1, 1]} : vector<8x128xf32> to vector<1x64xf32>
    %c0_113 = arith.constant 0 : index
    %c128 = arith.constant 128 : index
    %c0_114 = arith.constant 0 : index
    %220 = vector.load %arg2[%c0_113, %c128, %c0_114] : memref<1x512x64xf32, #tpu.memory_space<vmem>>, vector<1x64x64xf32>
    %221 = vector.shape_cast %220 : vector<1x64x64xf32> to vector<64x64xf32>
    %cst_115 = arith.constant dense<0.000000e+00> : vector<1x64xf32>
    %222 = tpu.matmul %219, %221, %cst_115 {dimension_numbers = #tpu.dot_dimension_numbers<[1], [0], [0], [1], [0, 0, 1, 1], [], []>} : vector<1x64xf32>, vector<64x64xf32>, vector<1x64xf32> -> vector<1x64xf32>
    %223 = arith.addf %218, %222 : vector<1x64xf32>
    %224 = vector.extract_strided_slice %209 {offsets = [3, 0], sizes = [1, 64], strides = [1, 1]} : vector<8x128xf32> to vector<1x64xf32>
    %c0_116 = arith.constant 0 : index
    %c192 = arith.constant 192 : index
    %c0_117 = arith.constant 0 : index
    %225 = vector.load %arg2[%c0_116, %c192, %c0_117] : memref<1x512x64xf32, #tpu.memory_space<vmem>>, vector<1x64x64xf32>
    %226 = vector.shape_cast %225 : vector<1x64x64xf32> to vector<64x64xf32>
    %cst_118 = arith.constant dense<0.000000e+00> : vector<1x64xf32>
    %227 = tpu.matmul %224, %226, %cst_118 {dimension_numbers = #tpu.dot_dimension_numbers<[1], [0], [0], [1], [0, 0, 1, 1], [], []>} : vector<1x64xf32>, vector<64x64xf32>, vector<1x64xf32> -> vector<1x64xf32>
    %228 = arith.addf %223, %227 : vector<1x64xf32>
    %229 = vector.extract_strided_slice %209 {offsets = [4, 0], sizes = [1, 64], strides = [1, 1]} : vector<8x128xf32> to vector<1x64xf32>
    %c0_119 = arith.constant 0 : index
    %c256 = arith.constant 256 : index
    %c0_120 = arith.constant 0 : index
    %230 = vector.load %arg2[%c0_119, %c256, %c0_120] : memref<1x512x64xf32, #tpu.memory_space<vmem>>, vector<1x64x64xf32>
    %231 = vector.shape_cast %230 : vector<1x64x64xf32> to vector<64x64xf32>
    %cst_121 = arith.constant dense<0.000000e+00> : vector<1x64xf32>
    %232 = tpu.matmul %229, %231, %cst_121 {dimension_numbers = #tpu.dot_dimension_numbers<[1], [0], [0], [1], [0, 0, 1, 1], [], []>} : vector<1x64xf32>, vector<64x64xf32>, vector<1x64xf32> -> vector<1x64xf32>
    %233 = arith.addf %228, %232 : vector<1x64xf32>
    %234 = vector.extract_strided_slice %209 {offsets = [5, 0], sizes = [1, 64], strides = [1, 1]} : vector<8x128xf32> to vector<1x64xf32>
    %c0_122 = arith.constant 0 : index
    %c320 = arith.constant 320 : index
    %c0_123 = arith.constant 0 : index
    %235 = vector.load %arg2[%c0_122, %c320, %c0_123] : memref<1x512x64xf32, #tpu.memory_space<vmem>>, vector<1x64x64xf32>
    %236 = vector.shape_cast %235 : vector<1x64x64xf32> to vector<64x64xf32>
    %cst_124 = arith.constant dense<0.000000e+00> : vector<1x64xf32>
    %237 = tpu.matmul %234, %236, %cst_124 {dimension_numbers = #tpu.dot_dimension_numbers<[1], [0], [0], [1], [0, 0, 1, 1], [], []>} : vector<1x64xf32>, vector<64x64xf32>, vector<1x64xf32> -> vector<1x64xf32>
    %238 = arith.addf %233, %237 : vector<1x64xf32>
    %239 = vector.extract_strided_slice %209 {offsets = [6, 0], sizes = [1, 64], strides = [1, 1]} : vector<8x128xf32> to vector<1x64xf32>
    %c0_125 = arith.constant 0 : index
    %c384 = arith.constant 384 : index
    %c0_126 = arith.constant 0 : index
    %240 = vector.load %arg2[%c0_125, %c384, %c0_126] : memref<1x512x64xf32, #tpu.memory_space<vmem>>, vector<1x64x64xf32>
    %241 = vector.shape_cast %240 : vector<1x64x64xf32> to vector<64x64xf32>
    %cst_127 = arith.constant dense<0.000000e+00> : vector<1x64xf32>
    %242 = tpu.matmul %239, %241, %cst_127 {dimension_numbers = #tpu.dot_dimension_numbers<[1], [0], [0], [1], [0, 0, 1, 1], [], []>} : vector<1x64xf32>, vector<64x64xf32>, vector<1x64xf32> -> vector<1x64xf32>
    %243 = arith.addf %238, %242 : vector<1x64xf32>
    %244 = vector.extract_strided_slice %209 {offsets = [7, 0], sizes = [1, 64], strides = [1, 1]} : vector<8x128xf32> to vector<1x64xf32>
    %c0_128 = arith.constant 0 : index
    %c448 = arith.constant 448 : index
    %c0_129 = arith.constant 0 : index
    %245 = vector.load %arg2[%c0_128, %c448, %c0_129] : memref<1x512x64xf32, #tpu.memory_space<vmem>>, vector<1x64x64xf32>
    %246 = vector.shape_cast %245 : vector<1x64x64xf32> to vector<64x64xf32>
    %cst_130 = arith.constant dense<0.000000e+00> : vector<1x64xf32>
    %247 = tpu.matmul %244, %246, %cst_130 {dimension_numbers = #tpu.dot_dimension_numbers<[1], [0], [0], [1], [0, 0, 1, 1], [], []>} : vector<1x64xf32>, vector<64x64xf32>, vector<1x64xf32> -> vector<1x64xf32>
    %248 = arith.addf %243, %247 : vector<1x64xf32>
    %c0_131 = arith.constant 0 : index
    %c0_132 = arith.constant 0 : index
    %c0_133 = arith.constant 0 : index
    %249 = vector.load %arg6[%c0_131, %c0_132, %c0_133] : memref<1x2x64xf32, #tpu.memory_space<vmem>>, vector<1x1x64xf32>
    %250 = vector.shape_cast %249 : vector<1x1x64xf32> to vector<1x64xf32>
    %251 = vector.shape_cast %248 : vector<1x64xf32> to vector<1x1x64xf32>
    tpu.vector_store %arg6[%c0_131, %c0_132, %c0_133], %251 {strides = array<i32>} : memref<1x2x64xf32, #tpu.memory_space<vmem>>, vector<1x1x64xf32>,
    %252 = vector.extract_strided_slice %209 {offsets = [0, 64], sizes = [1, 64], strides = [1, 1]} : vector<8x128xf32> to vector<1x64xf32>
    %c0_134 = arith.constant 0 : index
    %c0_135 = arith.constant 0 : index
    %c0_136 = arith.constant 0 : index
    %253 = vector.load %arg2[%c0_134, %c0_135, %c0_136] : memref<1x512x64xf32, #tpu.memory_space<vmem>>, vector<1x64x64xf32>
    %254 = vector.shape_cast %253 : vector<1x64x64xf32> to vector<64x64xf32>
    %cst_137 = arith.constant dense<0.000000e+00> : vector<1x64xf32>
    %255 = tpu.matmul %252, %254, %cst_137 {dimension_numbers = #tpu.dot_dimension_numbers<[1], [0], [0], [1], [0, 0, 1, 1], [], []>} : vector<1x64xf32>, vector<64x64xf32>, vector<1x64xf32> -> vector<1x64xf32>
    %256 = vector.extract_strided_slice %209 {offsets = [1, 64], sizes = [1, 64], strides = [1, 1]} : vector<8x128xf32> to vector<1x64xf32>
    %c0_138 = arith.constant 0 : index
    %c64_139 = arith.constant 64 : index
    %c0_140 = arith.constant 0 : index
    %257 = vector.load %arg2[%c0_138, %c64_139, %c0_140] : memref<1x512x64xf32, #tpu.memory_space<vmem>>, vector<1x64x64xf32>
    %258 = vector.shape_cast %257 : vector<1x64x64xf32> to vector<64x64xf32>
    %cst_141 = arith.constant dense<0.000000e+00> : vector<1x64xf32>
    %259 = tpu.matmul %256, %258, %cst_141 {dimension_numbers = #tpu.dot_dimension_numbers<[1], [0], [0], [1], [0, 0, 1, 1], [], []>} : vector<1x64xf32>, vector<64x64xf32>, vector<1x64xf32> -> vector<1x64xf32>
    %260 = arith.addf %255, %259 : vector<1x64xf32>
    %261 = vector.extract_strided_slice %209 {offsets = [2, 64], sizes = [1, 64], strides = [1, 1]} : vector<8x128xf32> to vector<1x64xf32>
    %c0_142 = arith.constant 0 : index
    %c128_143 = arith.constant 128 : index
    %c0_144 = arith.constant 0 : index
    %262 = vector.load %arg2[%c0_142, %c128_143, %c0_144] : memref<1x512x64xf32, #tpu.memory_space<vmem>>, vector<1x64x64xf32>
    %263 = vector.shape_cast %262 : vector<1x64x64xf32> to vector<64x64xf32>
    %cst_145 = arith.constant dense<0.000000e+00> : vector<1x64xf32>
    %264 = tpu.matmul %261, %263, %cst_145 {dimension_numbers = #tpu.dot_dimension_numbers<[1], [0], [0], [1], [0, 0, 1, 1], [], []>} : vector<1x64xf32>, vector<64x64xf32>, vector<1x64xf32> -> vector<1x64xf32>
    %265 = arith.addf %260, %264 : vector<1x64xf32>
    %266 = vector.extract_strided_slice %209 {offsets = [3, 64], sizes = [1, 64], strides = [1, 1]} : vector<8x128xf32> to vector<1x64xf32>
    %c0_146 = arith.constant 0 : index
    %c192_147 = arith.constant 192 : index
    %c0_148 = arith.constant 0 : index
    %267 = vector.load %arg2[%c0_146, %c192_147, %c0_148] : memref<1x512x64xf32, #tpu.memory_space<vmem>>, vector<1x64x64xf32>
    %268 = vector.shape_cast %267 : vector<1x64x64xf32> to vector<64x64xf32>
    %cst_149 = arith.constant dense<0.000000e+00> : vector<1x64xf32>
    %269 = tpu.matmul %266, %268, %cst_149 {dimension_numbers = #tpu.dot_dimension_numbers<[1], [0], [0], [1], [0, 0, 1, 1], [], []>} : vector<1x64xf32>, vector<64x64xf32>, vector<1x64xf32> -> vector<1x64xf32>
    %270 = arith.addf %265, %269 : vector<1x64xf32>
    %271 = vector.extract_strided_slice %209 {offsets = [4, 64], sizes = [1, 64], strides = [1, 1]} : vector<8x128xf32> to vector<1x64xf32>
    %c0_150 = arith.constant 0 : index
    %c256_151 = arith.constant 256 : index
    %c0_152 = arith.constant 0 : index
    %272 = vector.load %arg2[%c0_150, %c256_151, %c0_152] : memref<1x512x64xf32, #tpu.memory_space<vmem>>, vector<1x64x64xf32>
    %273 = vector.shape_cast %272 : vector<1x64x64xf32> to vector<64x64xf32>
    %cst_153 = arith.constant dense<0.000000e+00> : vector<1x64xf32>
    %274 = tpu.matmul %271, %273, %cst_153 {dimension_numbers = #tpu.dot_dimension_numbers<[1], [0], [0], [1], [0, 0, 1, 1], [], []>} : vector<1x64xf32>, vector<64x64xf32>, vector<1x64xf32> -> vector<1x64xf32>
    %275 = arith.addf %270, %274 : vector<1x64xf32>
    %276 = vector.extract_strided_slice %209 {offsets = [5, 64], sizes = [1, 64], strides = [1, 1]} : vector<8x128xf32> to vector<1x64xf32>
    %c0_154 = arith.constant 0 : index
    %c320_155 = arith.constant 320 : index
    %c0_156 = arith.constant 0 : index
    %277 = vector.load %arg2[%c0_154, %c320_155, %c0_156] : memref<1x512x64xf32, #tpu.memory_space<vmem>>, vector<1x64x64xf32>
    %278 = vector.shape_cast %277 : vector<1x64x64xf32> to vector<64x64xf32>
    %cst_157 = arith.constant dense<0.000000e+00> : vector<1x64xf32>
    %279 = tpu.matmul %276, %278, %cst_157 {dimension_numbers = #tpu.dot_dimension_numbers<[1], [0], [0], [1], [0, 0, 1, 1], [], []>} : vector<1x64xf32>, vector<64x64xf32>, vector<1x64xf32> -> vector<1x64xf32>
    %280 = arith.addf %275, %279 : vector<1x64xf32>
    %281 = vector.extract_strided_slice %209 {offsets = [6, 64], sizes = [1, 64], strides = [1, 1]} : vector<8x128xf32> to vector<1x64xf32>
    %c0_158 = arith.constant 0 : index
    %c384_159 = arith.constant 384 : index
    %c0_160 = arith.constant 0 : index
    %282 = vector.load %arg2[%c0_158, %c384_159, %c0_160] : memref<1x512x64xf32, #tpu.memory_space<vmem>>, vector<1x64x64xf32>
    %283 = vector.shape_cast %282 : vector<1x64x64xf32> to vector<64x64xf32>
    %cst_161 = arith.constant dense<0.000000e+00> : vector<1x64xf32>
    %284 = tpu.matmul %281, %283, %cst_161 {dimension_numbers = #tpu.dot_dimension_numbers<[1], [0], [0], [1], [0, 0, 1, 1], [], []>} : vector<1x64xf32>, vector<64x64xf32>, vector<1x64xf32> -> vector<1x64xf32>
    %285 = arith.addf %280, %284 : vector<1x64xf32>
    %286 = vector.extract_strided_slice %209 {offsets = [7, 64], sizes = [1, 64], strides = [1, 1]} : vector<8x128xf32> to vector<1x64xf32>
    %c0_162 = arith.constant 0 : index
    %c448_163 = arith.constant 448 : index
    %c0_164 = arith.constant 0 : index
    %287 = vector.load %arg2[%c0_162, %c448_163, %c0_164] : memref<1x512x64xf32, #tpu.memory_space<vmem>>, vector<1x64x64xf32>
    %288 = vector.shape_cast %287 : vector<1x64x64xf32> to vector<64x64xf32>
    %cst_165 = arith.constant dense<0.000000e+00> : vector<1x64xf32>
    %289 = tpu.matmul %286, %288, %cst_165 {dimension_numbers = #tpu.dot_dimension_numbers<[1], [0], [0], [1], [0, 0, 1, 1], [], []>} : vector<1x64xf32>, vector<64x64xf32>, vector<1x64xf32> -> vector<1x64xf32>
    %290 = arith.addf %285, %289 : vector<1x64xf32>
    %c0_166 = arith.constant 0 : index
    %c1_167 = arith.constant 1 : index
    %c0_168 = arith.constant 0 : index
    %291 = vector.load %arg6[%c0_166, %c1_167, %c0_168] : memref<1x2x64xf32, #tpu.memory_space<vmem>>, vector<1x1x64xf32>
    %292 = vector.shape_cast %291 : vector<1x1x64xf32> to vector<1x64xf32>
    %293 = vector.shape_cast %290 : vector<1x64xf32> to vector<1x1x64xf32>
    tpu.vector_store %arg6[%c0_166, %c1_167, %c0_168], %293 {strides = array<i32>} : memref<1x2x64xf32, #tpu.memory_space<vmem>>, vector<1x1x64xf32>,
    return
  }
  func.func @transform_0(%arg0: i32) -> (i32, i32, i32) {
    %c0_i32 = arith.constant 0 : i32
    %c0_i32_0 = arith.constant 0 : i32
    %c0_i32_1 = arith.constant 0 : i32
    return %arg0, %c0_i32, %c0_i32_0 : i32, i32, i32
  }
  func.func @transform_1(%arg0: i32) -> (i32, i32, i32) {
    %c0_i32 = arith.constant 0 : i32
    %c0_i32_0 = arith.constant 0 : i32
    %c0_i32_1 = arith.constant 0 : i32
    return %arg0, %c0_i32, %c0_i32_0 : i32, i32, i32
  }
  func.func @transform_2(%arg0: i32) -> (i32, i32) {
    %c0_i32 = arith.constant 0 : i32
    %c0_i32_0 = arith.constant 0 : i32
    %c0_i32_1 = arith.constant 0 : i32
    return %c0_i32, %c0_i32_0 : i32, i32
  }
  func.func @transform_3(%arg0: i32) -> (i32, i32, i32) {
    %c0_i32 = arith.constant 0 : i32
    %c0_i32_0 = arith.constant 0 : i32
    %c0_i32_1 = arith.constant 0 : i32
    %c0_i32_2 = arith.constant 0 : i32
    return %c0_i32, %c0_i32_0, %c0_i32_1 : i32, i32, i32
  }
  func.func @transform_4(%arg0: i32) -> (i32, i32, i32) {
    %c0_i32 = arith.constant 0 : i32
    %c0_i32_0 = arith.constant 0 : i32
    %c0_i32_1 = arith.constant 0 : i32
    %c0_i32_2 = arith.constant 0 : i32
    return %c0_i32, %c0_i32_0, %c0_i32_1 : i32, i32, i32
  }
  func.func @transform_5(%arg0: i32) -> (i32, i32, i32) {
    %c0_i32 = arith.constant 0 : i32
    %c0_i32_0 = arith.constant 0 : i32
    %c0_i32_1 = arith.constant 0 : i32
    return %arg0, %c0_i32, %c0_i32_0 : i32, i32, i32
  }
}

</mosaic_0001>

<bundles_post_ra>
// kernel: toy_vit_forward.1
= control target key start
LH: loop header
LB: loop body
LE: loop exit
PB: predicated region body
PF: predicated region fallthrough
CT: control target
= control target key end

     0   :  { %v4200_v0 = vmov 0   ;;  %v4201_v3 = vmov 0.0   ;;  %vm4202_vm0 = vmmov 0   ;;  %vm58_vm1 = vcmask 64512   ;;  %s4203_s30 = smov 64   ;;  %s4960_s2 = inlined_call_operand.vmem [shape: f32[32,16], index: 2, kind: input, shape index: {}]   ;;  %s4961_s4 = inlined_call_operand.vmem [shape: f32[2,80,1], index: 4, kind: input, shape index: {}]   ;;  %s4962_s0 = inlined_call_operand.vmem [shape: f32[1,9,128], index: 0, kind: input, shape index: {}]   ;;  %s4963_s3 = inlined_call_operand.vmem [shape: f32[2,48,8], index: 3, kind: input, shape index: {}]   ;;  %s4964_s1 = inlined_call_operand.vmem [shape: f32[1,512,64], index: 1, kind: input, shape index: {}]   ;;  %s4965_s5 = inlined_call_operand.vmem [shape: f32[1,2,64], index: 5, kind: output, shape index: {}]  }
   0x1   :  { %4178 = vset.pattern.permute.xlu0 %v4200_v0  ;;  %v20_v1 = vld [vmem:[%s4960_s2] sm:$0xff]  ;;  %4179 = vset.pattern.permute.xlu1 %v4200_v0  ;;  %v41_v2 = vld [vmem:[%s4961_s4 + $0x8] sm:$0xff]  ;;  %v42_v4 = vld [vmem:[%s4961_s4 + $0x10] sm:$0xff]  ;;  %vm305_vm2 = vcmask 1043456   ;;  %vm301_vm3 = vcmask 31744   ;;  %vm618_vm4 = vcmask 130048  }
   0x2   :  { %28 = vperm.xlu0 %4178, %v20_v1   ;;  %3507 = vmatprep.subr.mxu0 %v4201_v3  ;;  %v535_v5 = vld [vmem:[%s4961_s4 + $0x18] sm:$0xff]  ;;  %v724_v7 = vld [vmem:[%s4961_s4 + $0x28] sm:$0xff]  ;;  %v3266_v9 = vld [vmem:[%s4961_s4 + $0x50] sm:$0xff]  ;;  %vm1940_vm5 = vcmask 523264   ;;  %vm2577_vm6 = vcmask 516096  }
   0x3   :  { %3518 = vmatprep.subr.mxu1 %v4201_v3  ;;  %3509 = vmatprep.mubr.msk.f32.mxu0 %vm4202_vm0, %v4201_v3  ;;  %v615_v6 = vld [vmem:[%s4961_s4 + $0x38] sm:$0xff]  ;;  %v883_v8 = vld [vmem:[%s4961_s4 + $0x48] sm:$0xff]  ;;  %v3268_v10 = vld [vmem:[%s4961_s4 + $0x60] sm:$0xff] }
   0x4   :  { %3520 = vmatprep.mubr.msk.f32.mxu1 %vm4202_vm0, %v4201_v3  ;;  %v3281_v11 = vld [vmem:[%s4961_s4 + $0x68] sm:$0xff]  ;;  %v3289_v13 = vld [vmem:[%s4961_s4 + $0x78] sm:$0xff]  ;;  %v40_v15 = vld [vmem:[%s4961_s4] sm:$0xff] }
   0x5   :  { %v3284_v12 = vld [vmem:[%s4961_s4 + $0x88] sm:$0xff]  ;;  %v3293_v14 = vld [vmem:[%s4961_s4 + $0x98] sm:$0xff]  ;;  %45 = vperm.xlu1 %4179, %v40_v15   ;;  %v24_v18 = vld [vmem:[%s4962_s0] sm:$0xff] }
   0x6   :  { %50 = vperm.xlu0 %4178, %v41_v2   ;;  %v3246_v16 = vld [vmem:[%s4962_s0 + $0x8] ss:$0 sm:$0xff]  ;;  %v37_v21 = vld [vmem:[%s4963_s3] sm:$0xff]  ;;  %v39_v23 = vld [vmem:[%s4963_s3 + $0x10] sm:$0xff] }
   0x7   :  { %v38_v22 = vld [vmem:[%s4963_s3 + $0x8] sm:$0xff]  ;;  %v614_v38 = vld [vmem:[%s4961_s4 + $0x30] sm:$0xff]  ;;  %v722_v39 = vld [vmem:[%s4961_s4 + $0x20] sm:$0xff] }
   0x8   :  { %v4315_v33 = vld [vmem:[%s4960_s2 + $0x8] sm:$0xf]  ;;  %v882_v40 = vld [vmem:[%s4961_s4 + $0x40] sm:$0xff]  ;;  %v3267_v41 = vld [vmem:[%s4961_s4 + $0x58] sm:$0xff] }
   0x9   :  { %v4343_v53 = vld [vmem:[%s4960_s2 + $0x10] sm:$0xff]  ;;  %v4374_v15 = vld [vmem:[%s4960_s2 + $0x18] sm:$0x3] }
   0xa   :  { %55 = vperm.xlu0 %4178, %v42_v4  }
   0xe   :  { %538 = vperm.xlu0 %4178, %v535_v5  }
  0x12   :  { %717 = vperm.xlu0 %4178, %v615_v6   ;;  %v534_v6 = vld [vmem:[%s4963_s3 + $0x18] sm:$0xff] }
  0x16   :  { %806 = vperm.xlu0 %4178, %v724_v7   ;;  %v4204_v7 = vmov 0.0|0.0  }
  0x1a   :  { %981 = vperm.xlu0 %4178, %v883_v8  }
  0x1e   :  { %995 = vperm.xlu0 %4178, %v3266_v9  }
  0x22   :  { %1005 = vperm.xlu0 %4178, %v3268_v10  }
  0x26   :  { %1479 = vperm.xlu0 %4178, %v3281_v11  }
  0x2a   :  { %1654 = vperm.xlu0 %4178, %v3284_v12  }
  0x2e   :  { %1743 = vperm.xlu0 %4178, %v3289_v13  }
  0x32   :  { %1918 = vperm.xlu0 %4178, %v3293_v14  }
  0x81   :  { %v29_v17 = vpop.permute.xlu0 %28 }
  0x82   :  { %v35_v19 = vmul.f32 %v3246_v16, %v29_v17 }
  0x84   :  { %v4289_v20 = vadd.f32 %v35_v19, %v24_v18  ;;  %v46_v27 = vpop.permute.xlu1 %45 }
  0x85   :  { %v51_v26 = vpop.permute.xlu0 %50 }
  0x86   :  { %3508 = vmatpush3.msra.mxu0 %v4289_v20 }
  0x87   :  { %3510 = vmatmul.mubr.msk.f32.vlgmr.msra.gmra.mrb[0].mxu0 %vm58_vm1, %v37_v21  ;;  %3533 = vmatprep.subr.mxu0 %v4201_v3 }
  0x88   :  { %3512 = vmatprep.mubr.msk.f32.mxu0 %vm4202_vm0, %v4201_v3 }
  0x89   :  { %v56_v34 = vpop.permute.xlu0 %55 }
  0x8b   :  { %3513 = vmatmul.mubr.msk.f32.gmra.mrb[2].mxu0 %vm58_vm1, %v38_v22 }
  0x8c   :  { %3515 = vmatprep.mubr.msk.f32.mxu0 %vm4202_vm0, %v4201_v3 }
  0x8d   :  { %v539_v8 = vpop.permute.xlu0 %538 }
  0x8f   :  { %3516 = vmatmul.mubr.msk.f32.gmra.mrb[4].mxu0 %vm58_vm1, %v39_v23 }
  0x90   :  { %3535 = vmatprep.mubr.msk.f32.mxu0 %vm4202_vm0, %v4201_v3 }
 0x15a   :  { %v134_v24 = vpop.f32.mrb[0].mxu0 }
 0x15b   :  { %v3511_v25 = vpop.f32.mrb[1].mxu0  ;;  %v135_v29 = vadd.f32 %v134_v24, %v46_v27 }
 0x15e   :  { %v139_v28 = vpop.f32.mrb[2].mxu0 }
 0x15f   :  { %v140_v30 = vadd.f32 %v139_v28, %v51_v26  ;;  %v3514_v31 = vpop.f32.mrb[3].mxu0 }
 0x161   :  { %222 = vrot.lane.b32.xlu1 %v140_v30, %s4203_s30  ;;  %v148_v32 = vmul.f32 %v140_v30, %v135_v29 }
 0x162   :  { %v144_v35 = vpop.f32.mrb[4].mxu0 }
 0x163   :  { %v145_v36 = vadd.f32 %v144_v35, %v56_v34  ;;  %3519 = vmatpush3.msra.mxu1 %v148_v32  ;;  %v3517_v37 = vpop.f32.mrb[5].mxu0  ;;  %v718_v34 = vpop.permute.xlu0 %717 }
 0x164   :  { %3521 = vmatmul.mubr.msk.f32.vlgmr.msra.gmra.mrb[0].mxu1 %vm58_vm1, %v4315_v33  ;;  %3523 = vmatprep.subr.mxu1 %v4201_v3 }
 0x165   :  { %224 = vrot.lane.b32.xlu1 %v145_v36, %s4203_s30  ;;  %3525 = vmatprep.mubr.msk.f32.mxu1 %vm4202_vm0, %v4201_v3 }
 0x169   :  { %711 = vperm.xlu1 %4179, %v614_v38  }
 0x16d   :  { %727 = vperm.xlu1 %4179, %v722_v39  }
 0x171   :  { %975 = vperm.xlu1 %4179, %v882_v40  }
 0x175   :  { %1000 = vperm.xlu1 %4179, %v3267_v41  }
 0x1d3   :  { %v223_v42 = vpop.permute.xlu1 %222 }
 0x1d4   :  { %v226_v43 = vmul.f32 %v223_v42, %v135_v29  ;;  %v723_v42 = vld [vmem:[%s4963_s3 + $0x28] sm:$0xff] }
 0x1d6   :  { %3524 = vmatpush3.msra.mxu1 %v226_v43  ;;  %v807_v43 = vpop.permute.xlu0 %806 }
 0x1d7   :  { %3526 = vmatmul.mubr.msk.f32.vlgmr.msra.gmra.mrb[2].mxu1 %vm58_vm1, %v4315_v33  ;;  %3528 = vmatprep.subr.mxu1 %v4201_v3  ;;  %v225_v58 = vpop.permute.xlu1 %224 }
 0x1d8   :  { %3530 = vmatprep.mubr.msk.f32.mxu1 %vm4202_vm0, %v4201_v3 }
 0x1e8   :  { %v712_v31 = vpop.permute.xlu1 %711 }
 0x1ec   :  { %v728_v37 = vpop.permute.xlu1 %727 }
 0x237   :  { %v218_v44 = vpop.f32.mrb[0].mxu1 }
 0x238   :  { %v3522_v45 = vpop.f32.mrb[1].mxu1 }
 0x2aa   :  { %v293_v46 = vpop.f32.mrb[2].mxu1 }
 0x2ab   :  { %v297_v47 = vmax.f32 %v218_v44, %v293_v46  ;;  %v3527_v48 = vpop.f32.mrb[3].mxu1 }
 0x2ad   :  { %v298_v49 = vsub.f32 %v218_v44, %v297_v47  ;;  %v380_v50 = vsub.f32 %v293_v46, %v297_v47 }
 0x2af   :  { %v299_v51 = vmul.f32 1.442695, %v298_v49  ;;  %v381_v52 = vmul.f32 1.442695, %v380_v50 }
 0x2b1   :  { %4180 = vpow2.f32 %v299_v51 }
 0x2b2   :  { %4182 = vpow2.f32 %v381_v52 }
 0x2bb   :  { %v4181_v54 = vpop.eup %4180 }
 0x2bc   :  { %v4183_v55 = vpop.eup %4182  ;;  %3529 = vmatpush3.msk.msra.mxu1 %vm305_vm2, %v4181_v54 }
 0x2bd   :  { %v383_v56 = vadd.f32 %v4183_v55, %v4181_v54  ;;  %3534 = vmatpush3.msk.msra.mxu0 %vm305_vm2, %v4183_v55  ;;  %3531 = vmatmul.mubr.msk.f32.vlgmr.msra.gmra.mrb[4].mxu1 %vm301_vm3, %v4343_v53 }
 0x2be   :  { %3536 = vmatmul.mubr.msk.f32.vlgmr.msra.gmra.mrb[6].mxu0 %vm301_vm3, %v4343_v53  ;;  %3538 = vmatprep.subr.mxu1 %v4201_v3 }
 0x2bf   :  { %4184 = vrcp.f32 %v383_v56  ;;  %3540 = vmatprep.mubr.msk.f32.mxu1 %vm4202_vm0, %v4201_v3  ;;  %3543 = vmatprep.subr.mxu0 %v4201_v3 }
 0x2c0   :  { %3545 = vmatprep.mubr.msk.f32.mxu0 %vm4202_vm0, %v4201_v3 }
 0x2c9   :  { %v4185_v57 = vpop.eup %4184 }
 0x2ca   :  { %3539 = vmatpush3.msk.msra.mxu1 %vm305_vm2, %v4185_v57 }
 0x2cb   :  { %3541 = vmatmul.mubr.msk.f32.vlgmr.msra.gmra.mrb[6].mxu1 %vm301_vm3, %v4343_v53  ;;  %3941 = vmatprep.subr.bf16.mxu1 %v4204_v7 }
 0x2cc   :  { %3552 = vmatprep.mubr.msk.f32.mxu1 %vm4202_vm0, %v4201_v3 }
 0x390   :  { %v375_v59 = vpop.f32.mrb[4].mxu1 }
 0x391   :  { %v379_v60 = vmul.f32 %v375_v59, %v145_v36  ;;  %v453_v61 = vpop.f32.mrb[6].mxu0  ;;  %v3532_v62 = vpop.f32.mrb[5].mxu1  ;;  %v721_v36 = vld [vmem:[%s4963_s3 + $0x20] sm:$0xff] }
 0x392   :  { %v457_v63 = vmul.f32 %v453_v61, %v225_v58  ;;  %v3537_v0 = vpop.f32.mrb[7].mxu0  ;;  %v976_v62 = vpop.permute.xlu1 %975 }
 0x393   :  { %v982_v0 = vpop.permute.xlu0 %981 }
 0x394   :  { %v458_v1 = vadd.f32 %v457_v63, %v379_v60 }
 0x39e   :  { %v529_v2 = vpop.f32.mrb[6].mxu1 }
 0x39f   :  { %v533_v4 = vmul.f32 %v529_v2, %v458_v1  ;;  %v3542_v5 = vpop.f32.mrb[7].mxu1  ;;  %v3263_v2 = vld [vmem:[%s4963_s3 + $0x30] sm:$0xff] }
 0x3a0   :  { %v3265_v5 = vld [vmem:[%s4963_s3 + $0x40] sm:$0xff] }
 0x3a1   :  { %3544 = vmatpush3.msra.mxu0 %v533_v4  ;;  %v3264_v4 = vld [vmem:[%s4963_s3 + $0x38] sm:$0xff] }
 0x3a2   :  { %3546 = vmatmul.mubr.msk.f32.vlgmr.msra.gmra.mrb[8].mxu0 %vm58_vm1, %v534_v6  ;;  %3555 = vmatprep.subr.mxu0 %v4201_v3 }
 0x3a3   :  { %3557 = vmatprep.mubr.msk.f32.mxu0 %vm4202_vm0, %v4201_v3 }
 0x475   :  { %v610_v9 = vpop.f32.mrb[8].mxu0 }
 0x476   :  { %v611_v10 = vadd.f32 %v610_v9, %v539_v8  ;;  %v3547_v11 = vpop.f32.mrb[9].mxu0  ;;  %v996_v9 = vpop.permute.xlu0 %995 }
 0x478   :  { %v616_v12 = vadd.f32 %v611_v10, %v4289_v20  ;;  %v697_v20 = vlaneseq  ;;  %v1001_v10 = vpop.permute.xlu1 %1000 }
 0x47a   :  { %v617_v13 = vmul.f32 %v616_v12, %v616_v12  ;;  %v698_v23 = vshrl.u32 %v697_v20, 7 }
 0x47c   :  { %v3942_v14 = vpack.c.bf16 %v617_v13, %v616_v12  ;;  %v4381_v24 = vsub.s32 0, %v698_v23  ;;  %v4384_v26 = vsub.s32 1, %v698_v23  ;;  %v3292_v23 = vld [vmem:[%s4961_s4 + $0x90] sm:$0xff] }
 0x47e   :  { %3943 = vmatpush3.bf16.msra.mxu1 %v3942_v14 }
 0x47f   :  { %3560 = vmatprep.subr.mxu1 %v4201_v3 }
 0x481   :  { %3553 = vmatmul.mubr.msk.f32.vlgmr.msra.gmra.mrb[8].mxu1 %vm618_vm4, %v4374_v15 }
 0x482   :  { %3562 = vmatprep.mubr.msk.f32.mxu1 %vm4202_vm0, %v4201_v3 }
 0x554   :  { %v688_v16 = vpop.f32.mrb[8].mxu1 }
 0x555   :  { %v692_v17 = vmul.f32 %v688_v16, %v688_v16  ;;  %v3554_v18 = vpop.f32.mrb[9].mxu1  ;;  %v700_v25 = vrot.slane %v688_v16, %v4381_v24 }
 0x557   :  { %v694_v19 = vrot.slane %v692_v17, 7  ;;  %v701_v28 = vsub.f32 %v616_v12, %v700_v25  ;;  %v1006_v17 = vpop.permute.xlu0 %1005 }
 0x559   :  { %v696_v21 = vsub.f32 %v688_v16, %v694_v19 }
 0x55b   :  { %v702_v22 = vadd.f32 1e-05, %v696_v21  ;;  %v3283_v21 = vld [vmem:[%s4961_s4 + $0x80] sm:$0xff] }
 0x55d   :  { %4186 = vrsqrt.f32 %v702_v22  ;;  %v3287_v22 = vld [vmem:[%s4961_s4 + $0x70] sm:$0xff] }
 0x567   :  { %v4187_v27 = vpop.eup %4186 }
 0x568   :  { %v707_v29 = vrot.slane %v4187_v27, %v4384_v26 }
 0x56a   :  { %v708_v30 = vmul.f32 %v707_v29, %v701_v28 }
 0x56c   :  { %v714_v32 = vmul.f32 %v712_v31, %v708_v30 }
 0x56e   :  { %v720_v35 = vadd.f32 %v718_v34, %v714_v32 }
 0x570   :  { %3556 = vmatpush3.msra.mxu0 %v720_v35 }
 0x571   :  { %3558 = vmatmul.mubr.msk.f32.vlgmr.msra.gmra.mrb[10].mxu0 %vm58_vm1, %v721_v36  ;;  %3944 = vmatprep.subr.bf16.mxu0 %v4204_v7 }
 0x572   :  { %3569 = vmatprep.mubr.msk.f32.mxu0 %vm4202_vm0, %v4201_v3 }
 0x644   :  { %v799_v38 = vpop.f32.mrb[10].mxu0 }
 0x645   :  { %v800_v39 = vadd.f32 %v799_v38, %v728_v37  ;;  %v3559_v40 = vpop.f32.mrb[11].mxu0 }
 0x647   :  { %v803_v41 = vmax.f32 %v800_v39, 0.0 }
 0x649   :  { %3561 = vmatpush3.msra.mxu1 %v803_v41 }
 0x64a   :  { %3563 = vmatmul.mubr.msk.f32.vlgmr.msra.gmra.mrb[10].mxu1 %vm58_vm1, %v723_v42  ;;  %3572 = vmatprep.subr.mxu1 %v4201_v3 }
 0x64b   :  { %3574 = vmatprep.mubr.msk.f32.mxu1 %vm4202_vm0, %v4201_v3 }
 0x71d   :  { %v878_v44 = vpop.f32.mrb[10].mxu1 }
 0x71e   :  { %v879_v45 = vadd.f32 %v878_v44, %v807_v43  ;;  %v3564_v46 = vpop.f32.mrb[11].mxu1 }
 0x720   :  { %v884_v47 = vadd.f32 %v879_v45, %v720_v35 }
 0x722   :  { %v885_v48 = vmul.f32 %v884_v47, %v884_v47 }
 0x724   :  { %v3945_v49 = vpack.c.bf16 %v885_v48, %v884_v47 }
 0x726   :  { %3946 = vmatpush3.bf16.msra.mxu0 %v3945_v49 }
 0x727   :  { %3583 = vmatprep.subr.mxu0 %v4201_v3 }
 0x729   :  { %3570 = vmatmul.mubr.msk.f32.vlgmr.msra.gmra.mrb[12].mxu0 %vm618_vm4, %v4374_v15 }
 0x72a   :  { %3585 = vmatprep.mubr.msk.f32.mxu0 %vm4202_vm0, %v4201_v3 }
 0x7fc   :  { %v952_v50 = vpop.f32.mrb[12].mxu0 }
 0x7fd   :  { %v956_v51 = vmul.f32 %v952_v50, %v952_v50  ;;  %v3571_v52 = vpop.f32.mrb[13].mxu0  ;;  %v964_v57 = vrot.slane %v952_v50, %v4381_v24 }
 0x7fe   :  { %v1480_v52 = vpop.permute.xlu0 %1479 }
 0x7ff   :  { %v958_v54 = vrot.slane %v956_v51, 7  ;;  %v965_v59 = vsub.f32 %v884_v47, %v964_v57 }
 0x801   :  { %v960_v55 = vsub.f32 %v952_v50, %v958_v54 }
 0x803   :  { %v966_v56 = vadd.f32 1e-05, %v960_v55 }
 0x805   :  { %4188 = vrsqrt.f32 %v966_v56 }
 0x80f   :  { %v4189_v58 = vpop.eup %4188 }
 0x810   :  { %v971_v60 = vrot.slane %v4189_v58, %v4384_v26 }
 0x812   :  { %v972_v61 = vmul.f32 %v971_v60, %v965_v59 }
 0x814   :  { %v978_v63 = vmul.f32 %v976_v62, %v972_v61 }
 0x816   :  { %v4408_v1 = vadd.f32 %v982_v0, %v978_v63 }
 0x818   :  { %3573 = vmatpush3.msra.mxu1 %v4408_v1 }
 0x819   :  { %3575 = vmatmul.mubr.msk.f32.vlgmr.msra.gmra.mrb[12].mxu1 %vm58_vm1, %v3263_v2  ;;  %3598 = vmatprep.subr.mxu1 %v4201_v3 }
 0x81a   :  { %3577 = vmatprep.mubr.msk.f32.mxu1 %vm4202_vm0, %v4201_v3 }
 0x81d   :  { %3578 = vmatmul.mubr.msk.f32.gmra.mrb[14].mxu1 %vm58_vm1, %v3264_v4 }
 0x81e   :  { %3580 = vmatprep.mubr.msk.f32.mxu1 %vm4202_vm0, %v4201_v3 }
 0x821   :  { %3581 = vmatmul.mubr.msk.f32.gmra.mrb[16].mxu1 %vm58_vm1, %v3265_v5 }
 0x822   :  { %3600 = vmatprep.mubr.msk.f32.mxu1 %vm4202_vm0, %v4201_v3 }
 0x8ec   :  { %v1083_v6 = vpop.f32.mrb[12].mxu1 }
 0x8ed   :  { %v3576_v8 = vpop.f32.mrb[13].mxu1  ;;  %v1084_v12 = vadd.f32 %v1083_v6, %v996_v9 }
 0x8f0   :  { %v1088_v11 = vpop.f32.mrb[14].mxu1 }
 0x8f1   :  { %v1089_v13 = vadd.f32 %v1088_v11, %v1001_v10  ;;  %v3579_v14 = vpop.f32.mrb[15].mxu1  ;;  %v1655_v11 = vpop.permute.xlu0 %1654 }
 0x8f3   :  { %v1097_v16 = vmul.f32 %v1089_v13, %v1084_v12  ;;  %1168 = vrot.lane.b32.xlu1 %v1089_v13, %s4203_s30  ;;  %v3286_v13 = vld [vmem:[%s4963_s3 + $0x50] sm:$0xff] }
 0x8f4   :  { %v1093_v18 = vpop.f32.mrb[16].mxu1 }
 0x8f5   :  { %v1094_v19 = vadd.f32 %v1093_v18, %v1006_v17  ;;  %3584 = vmatpush3.msra.mxu0 %v1097_v16  ;;  %v3582_v20 = vpop.f32.mrb[17].mxu1 }
 0x8f6   :  { %3586 = vmatmul.mubr.msk.f32.vlgmr.msra.gmra.mrb[14].mxu0 %vm58_vm1, %v4315_v33  ;;  %3588 = vmatprep.subr.mxu0 %v4201_v3  ;;  %v3288_v20 = vld [vmem:[%s4963_s3 + $0x58] sm:$0xff] }
 0x8f7   :  { %1170 = vrot.lane.b32.xlu1 %v1094_v19, %s4203_s30  ;;  %3590 = vmatprep.mubr.msk.f32.mxu0 %vm4202_vm0, %v4201_v3 }
 0x8fb   :  { %1648 = vperm.xlu1 %4179, %v3283_v21   ;;  %v1744_v21 = vpop.permute.xlu0 %1743 }
 0x8ff   :  { %1664 = vperm.xlu1 %4179, %v3287_v22  }
 0x903   :  { %1912 = vperm.xlu1 %4179, %v3292_v23  }
 0x965   :  { %v1169_v25 = vpop.permute.xlu1 %1168 }
 0x966   :  { %v1172_v27 = vmul.f32 %v1169_v25, %v1084_v12 }
 0x968   :  { %3589 = vmatpush3.msra.mxu0 %v1172_v27 }
 0x969   :  { %3591 = vmatmul.mubr.msk.f32.vlgmr.msra.gmra.mrb[16].mxu0 %vm58_vm1, %v4315_v33  ;;  %3593 = vmatprep.subr.mxu0 %v4201_v3  ;;  %v1171_v41 = vpop.permute.xlu1 %1170 }
 0x96a   :  { %3595 = vmatprep.mubr.msk.f32.mxu0 %vm4202_vm0, %v4201_v3 }
 0x97a   :  { %v1649_v9 = vpop.permute.xlu1 %1648 }
 0x97e   :  { %v1665_v14 = vpop.permute.xlu1 %1664 }
 0x9c9   :  { %v1164_v28 = vpop.f32.mrb[14].mxu0 }
 0x9ca   :  { %v3587_v29 = vpop.f32.mrb[15].mxu0 }
 0xa3c   :  { %v1239_v30 = vpop.f32.mrb[16].mxu0 }
 0xa3d   :  { %v1243_v31 = vmax.f32 %v1164_v28, %v1239_v30  ;;  %v3592_v32 = vpop.f32.mrb[17].mxu0 }
 0xa3f   :  { %v1244_v34 = vsub.f32 %v1164_v28, %v1243_v31  ;;  %v1321_v35 = vsub.f32 %v1239_v30, %v1243_v31  ;;  %v1930_v30 = vld [vmem:[%s4964_s1 + $0x40] sm:$0xff]  ;;  %v1931_v31 = vld [vmem:[%s4964_s1 + $0x48] sm:$0xff] }
 0xa40   :  { %v3954_v32 = vpack.c.bf16 %v1931_v31, %v1930_v30  ;;  %v2170_v30 = vld [vmem:[%s4964_s1 + $0xd8] sm:$0xff] }
 0xa41   :  { %v1245_v36 = vmul.f32 1.442695, %v1244_v34  ;;  %v1322_v37 = vmul.f32 1.442695, %v1321_v35  ;;  %v1933_v34 = vld [vmem:[%s4964_s1 + $0x58] sm:$0xff] }
 0xa43   :  { %4190 = vpow2.f32 %v1245_v36  ;;  %v1934_v36 = vld [vmem:[%s4964_s1 + $0x60] sm:$0xff] }
 0xa44   :  { %4192 = vpow2.f32 %v1322_v37  ;;  %v1935_v37 = vld [vmem:[%s4964_s1 + $0x68] sm:$0xff] }
 0xa4d   :  { %v4191_v38 = vpop.eup %4190 }
 0xa4e   :  { %v4193_v39 = vpop.eup %4192  ;;  %3594 = vmatpush3.msk.msra.mxu0 %vm305_vm2, %v4191_v38 }
 0xa4f   :  { %v1324_v33 = vadd.f32 %v4193_v39, %v4191_v38  ;;  %3599 = vmatpush3.msk.msra.mxu1 %vm305_vm2, %v4193_v39  ;;  %3596 = vmatmul.mubr.msk.f32.vlgmr.msra.gmra.mrb[18].mxu0 %vm301_vm3, %v4343_v53  ;;  %v3960_v38 = vpack.c.bf16 %v1935_v37, %v1934_v36  ;;  %v1936_v39 = vld [vmem:[%s4964_s1 + $0x70] sm:$0xff]  ;;  %v2174_v36 = vld [vmem:[%s4964_s1 + $0xf8] sm:$0xff] }
 0xa50   :  { %3601 = vmatmul.mubr.msk.f32.vlgmr.msra.gmra.mrb[18].mxu1 %vm301_vm3, %v4343_v53  ;;  %3603 = vmatprep.subr.mxu0 %v4201_v3 }
 0xa51   :  { %4194 = vrcp.f32 %v1324_v33  ;;  %3605 = vmatprep.mubr.msk.f32.mxu0 %vm4202_vm0, %v4201_v3  ;;  %3608 = vmatprep.subr.mxu1 %v4201_v3  ;;  %v1937_v33 = vld [vmem:[%s4964_s1 + $0x78] sm:$0xff] }
 0xa52   :  { %3610 = vmatprep.mubr.msk.f32.mxu1 %vm4202_vm0, %v4201_v3 }
 0xa5b   :  { %v4195_v40 = vpop.eup %4194 }
 0xa5c   :  { %3604 = vmatpush3.msk.msra.mxu0 %vm305_vm2, %v4195_v40  ;;  %v3963_v40 = vpack.c.bf16 %v1937_v33, %v1936_v39  ;;  %v2250_v39 = vld [vmem:[%s4964_s1 + $0x108] sm:$0xff] }
 0xa5d   :  { %3606 = vmatmul.mubr.msk.f32.vlgmr.msra.gmra.mrb[20].mxu0 %vm301_vm3, %v4343_v53  ;;  %3947 = vmatprep.subr.bf16.mxu0 %v4204_v7  ;;  %v3280_v53 = vld [vmem:[%s4963_s3 + $0x48] sm:$0xff] }
 0xa5e   :  { %3617 = vmatprep.mubr.msk.f32.mxu0 %vm4202_vm0, %v4201_v3 }
 0xb22   :  { %v1316_v42 = vpop.f32.mrb[18].mxu0 }
 0xb23   :  { %v1320_v43 = vmul.f32 %v1316_v42, %v1094_v19  ;;  %v1394_v44 = vpop.f32.mrb[18].mxu1  ;;  %v3597_v45 = vpop.f32.mrb[19].mxu0 }
 0xb24   :  { %v1398_v46 = vmul.f32 %v1394_v44, %v1171_v41  ;;  %v3602_v47 = vpop.f32.mrb[19].mxu1 }
 0xb26   :  { %v1399_v48 = vadd.f32 %v1398_v46, %v1320_v43 }
 0xb30   :  { %v1470_v49 = vpop.f32.mrb[20].mxu0 }
 0xb31   :  { %v1474_v50 = vmul.f32 %v1470_v49, %v1399_v48  ;;  %v3607_v51 = vpop.f32.mrb[21].mxu0 }
 0xb33   :  { %3609 = vmatpush3.msra.mxu1 %v1474_v50 }
 0xb34   :  { %3611 = vmatmul.mubr.msk.f32.vlgmr.msra.gmra.mrb[20].mxu1 %vm58_vm1, %v3280_v53  ;;  %3620 = vmatprep.subr.mxu1 %v4201_v3  ;;  %v1913_v53 = vpop.permute.xlu1 %1912 }
 0xb35   :  { %3622 = vmatprep.mubr.msk.f32.mxu1 %vm4202_vm0, %v4201_v3 }
 0xc07   :  { %v1551_v54 = vpop.f32.mrb[20].mxu1 }
 0xc08   :  { %v1552_v55 = vadd.f32 %v1551_v54, %v1480_v52  ;;  %v3612_v56 = vpop.f32.mrb[21].mxu1  ;;  %v1922_v54 = vld [vmem:[%s4964_s1] sm:$0xff] }
 0xc09   :  { %v1919_v56 = vpop.permute.xlu0 %1918 }
 0xc0a   :  { %v1557_v57 = vadd.f32 %v1552_v55, %v4408_v1  ;;  %v1923_v55 = vld [vmem:[%s4964_s1 + $0x8] sm:$0xff] }
 0xc0c   :  { %v1558_v58 = vmul.f32 %v1557_v57, %v1557_v57 }
 0xc0e   :  { %v3948_v59 = vpack.c.bf16 %v1558_v58, %v1557_v57  ;;  %v1924_v58 = vld [vmem:[%s4964_s1 + $0x10] sm:$0xff] }
 0xc10   :  { %3949 = vmatpush3.bf16.msra.mxu0 %v3948_v59  ;;  %v1925_v59 = vld [vmem:[%s4964_s1 + $0x18] sm:$0xff] }
 0xc11   :  { %3625 = vmatprep.subr.mxu0 %v4201_v3 }
 0xc13   :  { %3618 = vmatmul.mubr.msk.f32.vlgmr.msra.gmra.mrb[22].mxu0 %vm618_vm4, %v4374_v15 }
 0xc14   :  { %3627 = vmatprep.mubr.msk.f32.mxu0 %vm4202_vm0, %v4201_v3 }
 0xce6   :  { %v1625_v60 = vpop.f32.mrb[22].mxu0 }
 0xce7   :  { %v1629_v61 = vmul.f32 %v1625_v60, %v1625_v60  ;;  %v3619_v62 = vpop.f32.mrb[23].mxu0  ;;  %v1637_v1 = vrot.slane %v1625_v60, %v4381_v24 }
 0xce9   :  { %v1631_v63 = vrot.slane %v1629_v61, 7  ;;  %v1638_v5 = vsub.f32 %v1557_v57, %v1637_v1  ;;  %v4560_v61 = vpack.c.bf16 %v1925_v59, %v1924_v58  ;;  %v2337_v58 = vld [vmem:[%s4964_s1 + $0x170] sm:$0xff]  ;;  %v2338_v59 = vld [vmem:[%s4964_s1 + $0x178] sm:$0xff] }
 0xceb   :  { %v1633_v0 = vsub.f32 %v1625_v60, %v1631_v63  ;;  %v1926_v63 = vld [vmem:[%s4964_s1 + $0x20] sm:$0xff] }
 0xced   :  { %v1639_v2 = vadd.f32 1e-05, %v1633_v0  ;;  %v1927_v0 = vld [vmem:[%s4964_s1 + $0x28] sm:$0xff] }
 0xcee   :  { %v4578_v1 = vpack.c.bf16 %v1927_v0, %v1926_v63  ;;  %v2414_v63 = vld [vmem:[%s4964_s1 + $0x188] sm:$0xff] }
 0xcef   :  { %4196 = vrsqrt.f32 %v1639_v2 }
 0xcf9   :  { %v4197_v4 = vpop.eup %4196 }
 0xcfa   :  { %v1644_v6 = vrot.slane %v4197_v4, %v4384_v26 }
 0xcfc   :  { %v1645_v8 = vmul.f32 %v1644_v6, %v1638_v5  ;;  %v1928_v5 = vld [vmem:[%s4964_s1 + $0x30] sm:$0xff]  ;;  %v1929_v6 = vld [vmem:[%s4964_s1 + $0x38] sm:$0xff] }
 0xcfe   :  { %v1651_v10 = vmul.f32 %v1649_v9, %v1645_v8  ;;  %v4596_v9 = vpack.c.bf16 %v1929_v6, %v1928_v5  ;;  %v2416_v5 = vld [vmem:[%s4964_s1 + $0x198] sm:$0xff] }
 0xd00   :  { %v1657_v12 = vadd.f32 %v1655_v11, %v1651_v10  ;;  %v2085_v11 = vld [vmem:[%s4964_s1 + $0x80] sm:$0xff] }
 0xd02   :  { %3621 = vmatpush3.msra.mxu1 %v1657_v12 }
 0xd03   :  { %3623 = vmatmul.mubr.msk.f32.vlgmr.msra.gmra.mrb[22].mxu1 %vm58_vm1, %v3286_v13  ;;  %3950 = vmatprep.subr.bf16.mxu1 %v4204_v7 }
 0xd04   :  { %3634 = vmatprep.mubr.msk.f32.mxu1 %vm4202_vm0, %v4201_v3 }
 0xdd6   :  { %v1736_v16 = vpop.f32.mrb[22].mxu1 }
 0xdd7   :  { %v1737_v17 = vadd.f32 %v1736_v16, %v1665_v14  ;;  %v3624_v18 = vpop.f32.mrb[23].mxu1  ;;  %v2087_v14 = vld [vmem:[%s4964_s1 + $0x90] sm:$0xff]  ;;  %v2088_v16 = vld [vmem:[%s4964_s1 + $0x98] sm:$0xff] }
 0xdd8   :  { %v2089_v18 = vld [vmem:[%s4964_s1 + $0xa0] sm:$0xff] }
 0xdd9   :  { %v1740_v19 = vmax.f32 %v1737_v17, 0.0  ;;  %v4625_v17 = vpack.c.bf16 %v2088_v16, %v2087_v14  ;;  %v2419_v14 = vld [vmem:[%s4964_s1 + $0x1b0] sm:$0xff]  ;;  %v2420_v16 = vld [vmem:[%s4964_s1 + $0x1b8] sm:$0xff] }
 0xddb   :  { %3626 = vmatpush3.msra.mxu0 %v1740_v19  ;;  %v2090_v19 = vld [vmem:[%s4964_s1 + $0xa8] sm:$0xff] }
 0xddc   :  { %3628 = vmatmul.mubr.msk.f32.vlgmr.msra.gmra.mrb[24].mxu0 %vm58_vm1, %v3288_v20  ;;  %3953 = vmatprep.subr.bf16.mxu0 %v4204_v7  ;;  %v4637_v20 = vpack.c.bf16 %v2090_v19, %v2089_v18  ;;  %v4825_v18 = vpack.c.bf16 %v2420_v16, %v2419_v14  ;;  %v2495_v19 = vld [vmem:[%s4964_s1 + $0x1c0] sm:$0xff] }
 0xddd   :  { %3653 = vmatprep.mubr.msk.f32.mxu0 %vm4202_vm0, %v4201_v3  ;;  %3955 = vmatpush3.bf16.msra.mxu0 %v3954_v32 }
 0xdde   :  { %3956 = vmatprep.subr.bf16.mxu0 %v4204_v7 }
 0xeaf   :  { %v1815_v22 = vpop.f32.mrb[24].mxu0 }
 0xeb0   :  { %v1816_v23 = vadd.f32 %v1815_v22, %v1744_v21  ;;  %v3629_v25 = vpop.f32.mrb[25].mxu0  ;;  %v2091_v21 = vld [vmem:[%s4964_s1 + $0xb0] sm:$0xff]  ;;  %v2092_v22 = vld [vmem:[%s4964_s1 + $0xb8] sm:$0xff] }
 0xeb1   :  { %v2167_v25 = vld [vmem:[%s4964_s1 + $0xc0] sm:$0xff] }
 0xeb2   :  { %v1821_v27 = vadd.f32 %v1816_v23, %v1657_v12  ;;  %v2086_v12 = vld [vmem:[%s4964_s1 + $0x88] sm:$0xff]  ;;  %v4647_v23 = vpack.c.bf16 %v2092_v22, %v2091_v21 }
 0xeb3   :  { %v4613_v13 = vpack.c.bf16 %v2086_v12, %v2085_v11  ;;  %v2417_v11 = vld [vmem:[%s4964_s1 + $0x1a0] sm:$0xff]  ;;  %v2418_v12 = vld [vmem:[%s4964_s1 + $0x1a8] sm:$0xff] }
 0xeb4   :  { %v1822_v28 = vmul.f32 %v1821_v27, %v1821_v27  ;;  %v2496_v21 = vld [vmem:[%s4964_s1 + $0x1c8] sm:$0xff] }
 0xeb5   :  { %v4835_v22 = vpack.c.bf16 %v2496_v21, %v2495_v19 }
 0xeb6   :  { %v3951_v29 = vpack.c.bf16 %v1822_v28, %v1821_v27 }
 0xeb8   :  { %3952 = vmatpush3.bf16.msra.mxu1 %v3951_v29  ;;  %v2169_v29 = vld [vmem:[%s4964_s1 + $0xd0] sm:$0xff] }
 0xeb9   :  { %4049 = vmatprep.subr.bf16.mxu1 %v4204_v7  ;;  %v4668_v31 = vpack.c.bf16 %v2170_v30, %v2169_v29  ;;  %v2499_v30 = vld [vmem:[%s4964_s1 + $0x1e0] sm:$0xff] }
 0xebb   :  { %3635 = vmatmul.mubr.msk.f32.vlgmr.msra.gmra.mrb[24].mxu1 %vm618_vm4, %v4374_v15  ;;  %v1932_v15 = vld [vmem:[%s4964_s1 + $0x50] sm:$0xff] }
 0xebc   :  { %3805 = vmatprep.mubr.msk.f32.mxu1 %vm4202_vm0, %v4201_v3  ;;  %4051 = vmatpush3.bf16.msra.mxu1 %v3954_v32  ;;  %v3957_v35 = vpack.c.bf16 %v1933_v34, %v1932_v15  ;;  %v2171_v32 = vld [vmem:[%s4964_s1 + $0xe0] sm:$0xff]  ;;  %v2172_v15 = vld [vmem:[%s4964_s1 + $0xe8] sm:$0xff] }
 0xebd   :  { %4052 = vmatprep.subr.bf16.mxu1 %v4204_v7  ;;  %v4680_v34 = vpack.c.bf16 %v2172_v15, %v2171_v32  ;;  %v2500_v32 = vld [vmem:[%s4964_s1 + $0x1e8] sm:$0xff]  ;;  %v2501_v15 = vld [vmem:[%s4964_s1 + $0x1f0] sm:$0xff] }
 0xebe   :  { %3958 = vmatpush3.bf16.msra.mxu0 %v3957_v35 }
 0xebf   :  { %3959 = vmatprep.subr.bf16.mxu0 %v4204_v7 }
 0xec0   :  { %4054 = vmatpush3.bf16.msra.mxu1 %v3957_v35  ;;  %v2173_v35 = vld [vmem:[%s4964_s1 + $0xf0] sm:$0xff] }
 0xec1   :  { %4055 = vmatprep.subr.bf16.mxu1 %v4204_v7  ;;  %v4690_v37 = vpack.c.bf16 %v2174_v36, %v2173_v35  ;;  %v2502_v35 = vld [vmem:[%s4964_s1 + $0x1f8] sm:$0xff] }
 0xec2   :  { %3961 = vmatpush3.bf16.msra.mxu0 %v3960_v38  ;;  %v4870_v36 = vpack.c.bf16 %v2502_v35, %v2501_v15 }
 0xec3   :  { %3962 = vmatprep.subr.bf16.mxu0 %v4204_v7 }
 0xec4   :  { %4057 = vmatpush3.bf16.msra.mxu1 %v3960_v38  ;;  %v2249_v38 = vld [vmem:[%s4964_s1 + $0x100] sm:$0xff] }
 0xec5   :  { %4058 = vmatprep.subr.bf16.mxu1 %v4204_v7  ;;  %v4700_v33 = vpack.c.bf16 %v2250_v39, %v2249_v38 }
 0xec6   :  { %3964 = vmatpush3.bf16.msra.mxu0 %v3963_v40 }
 0xec7   :  { %3965 = vmatprep.subr.bf16.mxu0 %v4204_v7 }
 0xec8   :  { %4060 = vmatpush3.bf16.msra.mxu1 %v3963_v40  ;;  %v2251_v40 = vld [vmem:[%s4964_s1 + $0x110] sm:$0xff] }
 0xec9   :  { %4061 = vmatprep.subr.bf16.mxu1 %v4204_v7 }
 0xf8e   :  { %v1889_v41 = vpop.f32.mrb[24].mxu1 }
 0xf8f   :  { %v1893_v42 = vmul.f32 %v1889_v41, %v1889_v41  ;;  %v3636_v43 = vpop.f32.mrb[25].mxu1  ;;  %v1901_v47 = vrot.slane %v1889_v41, %v4381_v24  ;;  %v4545_v24 = vpack.c.bf16 %v1923_v55, %v1922_v54  ;;  %v2335_v55 = vld [vmem:[%s4964_s1 + $0x160] sm:$0xff] }
 0xf90   :  { %v2253_v43 = vld [vmem:[%s4964_s1 + $0x120] sm:$0xff] }
 0xf91   :  { %v1895_v44 = vrot.slane %v1893_v42, 7  ;;  %v1902_v49 = vsub.f32 %v1821_v27, %v1901_v47  ;;  %v2168_v27 = vld [vmem:[%s4964_s1 + $0xc8] sm:$0xff]  ;;  %v2256_v47 = vld [vmem:[%s4964_s1 + $0x138] sm:$0xff] }
 0xf92   :  { %v4657_v28 = vpack.c.bf16 %v2168_v27, %v2167_v25  ;;  %v2497_v25 = vld [vmem:[%s4964_s1 + $0x1d0] sm:$0xff]  ;;  %v2498_v27 = vld [vmem:[%s4964_s1 + $0x1d8] sm:$0xff] }
 0xf93   :  { %v1897_v45 = vsub.f32 %v1889_v41, %v1895_v44  ;;  %v2252_v41 = vld [vmem:[%s4964_s1 + $0x118] sm:$0xff]  ;;  %v2254_v44 = vld [vmem:[%s4964_s1 + $0x128] sm:$0xff]  ;;  %v4848_v29 = vpack.c.bf16 %v2498_v27, %v2497_v25 }
 0xf94   :  { %v4713_v42 = vpack.c.bf16 %v2252_v41, %v2251_v40 }
 0xf95   :  { %v1903_v46 = vadd.f32 1e-05, %v1897_v45  ;;  %v4725_v45 = vpack.c.bf16 %v2254_v44, %v2253_v43 }
 0xf97   :  { %4198 = vrsqrt.f32 %v1903_v46  ;;  %v2255_v46 = vld [vmem:[%s4964_s1 + $0x130] sm:$0xff] }
 0xfa1   :  { %v4199_v48 = vpop.eup %4198 }
 0xfa2   :  { %v1908_v50 = vrot.slane %v4199_v48, %v4384_v26  ;;  %v4735_v48 = vpack.c.bf16 %v2256_v47, %v2255_v46 }
 0xfa4   :  { %v1909_v51 = vmul.f32 %v1908_v50, %v1902_v49  ;;  %v2331_v49 = vld [vmem:[%s4964_s1 + $0x140] sm:$0xff]  ;;  %v2332_v50 = vld [vmem:[%s4964_s1 + $0x148] sm:$0xff] }
 0xfa6   :  { %v1915_v52 = vmul.f32 %v1913_v53, %v1909_v51  ;;  %v4745_v51 = vpack.c.bf16 %v2332_v50, %v2331_v49  ;;  %v2333_v53 = vld [vmem:[%s4964_s1 + $0x150] sm:$0xff] }
 0xfa8   :  { %v4543_v57 = vadd.f32 %v1919_v56, %v1915_v52  ;;  %v2334_v52 = vld [vmem:[%s4964_s1 + $0x158] sm:$0xff]  ;;  %v2336_v56 = vld [vmem:[%s4964_s1 + $0x168] sm:$0xff] }
 0xfa9   :  { %v4758_v54 = vpack.c.bf16 %v2334_v52, %v2333_v53 }
 0xfaa   :  { %2669 = vrot.lane.b32.xlu0 %v4543_v57, %s4203_s30  ;;  %v1939_v26 = vrot.slane %v4543_v57, 1  ;;  %v2175_v60 = vrot.slane %v4543_v57, 3  ;;  %v2093_v62 = vrot.slane %v4543_v57, 2  ;;  %v2339_v2 = vrot.slane %v4543_v57, 5 }
 0xfab   :  { %v2257_v4 = vrot.slane %v4543_v57, 4  ;;  %v2503_v8 = vrot.slane %v4543_v57, 7  ;;  %v2421_v10 = vrot.slane %v4543_v57, 6 }
 0xfac   :  { %2595 = vrot.lane.b32.xlu1 %v1939_v26, %s4203_s30  ;;  %3654 = vmatmul.mubr.msk.f32.vlgmr.msra.gmra.mrb[26].mxu0 %vm1940_vm5, %v1939_v26  ;;  %v4770_v26 = vpack.c.bf16 %v2336_v56, %v2335_v55 }
 0xfad   :  { %3967 = vmatpush3.bf16.msra.mxu0 %v4545_v24  ;;  %3672 = vmatprep.mubr.msk.f32.mxu0 %vm4202_vm0, %v4201_v3 }
 0xfae   :  { %2834 = vrot.lane.b32.xlu0 %v2175_v60, %s4203_s30  ;;  %3968 = vmatprep.subr.bf16.mxu0 %v4204_v7 }
 0xfb0   :  { %2751 = vrot.lane.b32.xlu1 %v2093_v62, %s4203_s30 }
 0xfb1   :  { %3970 = vmatpush3.bf16.msra.mxu0 %v4560_v61 }
 0xfb2   :  { %3000 = vrot.lane.b32.xlu0 %v2339_v2, %s4203_s30  ;;  %3971 = vmatprep.subr.bf16.mxu0 %v4204_v7 }
 0xfb4   :  { %2917 = vrot.lane.b32.xlu1 %v2257_v4, %s4203_s30 }
 0xfb5   :  { %3973 = vmatpush3.bf16.msra.mxu0 %v4578_v1 }
 0xfb6   :  { %3166 = vrot.lane.b32.xlu0 %v2503_v8, %s4203_s30  ;;  %3974 = vmatprep.subr.bf16.mxu0 %v4204_v7 }
 0xfb8   :  { %3083 = vrot.lane.b32.xlu1 %v2421_v10, %s4203_s30 }
 0xfb9   :  { %3976 = vmatpush3.bf16.msra.mxu0 %v4596_v9 }
 0xfba   :  { %3977 = vmatprep.subr.bf16.mxu0 %v4204_v7 }
 0xfbc   :  { %3673 = vmatmul.mubr.msk.f32.vlgmr.msra.gmra.mrb[26].mxu0 %vm1940_vm5, %v4543_v57 }
 0xfbd   :  { %3979 = vmatpush3.bf16.msra.mxu0 %v4613_v13  ;;  %3691 = vmatprep.mubr.msk.f32.mxu0 %vm4202_vm0, %v4201_v3 }
 0xfbe   :  { %3980 = vmatprep.subr.bf16.mxu0 %v4204_v7 }
 0xfc1   :  { %3982 = vmatpush3.bf16.msra.mxu0 %v4625_v17 }
 0xfc2   :  { %3983 = vmatprep.subr.bf16.mxu0 %v4204_v7 }
 0xfc5   :  { %3985 = vmatpush3.bf16.msra.mxu0 %v4637_v20 }
 0xfc6   :  { %3986 = vmatprep.subr.bf16.mxu0 %v4204_v7 }
 0xfc9   :  { %3988 = vmatpush3.bf16.msra.mxu0 %v4647_v23 }
 0xfca   :  { %3989 = vmatprep.subr.bf16.mxu0 %v4204_v7 }
 0xfcc   :  { %3692 = vmatmul.mubr.msk.f32.vlgmr.msra.gmra.mrb[26].mxu0 %vm1940_vm5, %v2093_v62  ;;  %v2413_v62 = vld [vmem:[%s4964_s1 + $0x180] sm:$0xff] }
 0xfcd   :  { %3991 = vmatpush3.bf16.msra.mxu0 %v4657_v28  ;;  %3710 = vmatprep.mubr.msk.f32.mxu0 %vm4202_vm0, %v4201_v3  ;;  %v4790_v0 = vpack.c.bf16 %v2414_v63, %v2413_v62 }
 0xfce   :  { %3992 = vmatprep.subr.bf16.mxu0 %v4204_v7 }
 0xfd1   :  { %3994 = vmatpush3.bf16.msra.mxu0 %v4668_v31 }
 0xfd2   :  { %3995 = vmatprep.subr.bf16.mxu0 %v4204_v7 }
 0xfd5   :  { %3997 = vmatpush3.bf16.msra.mxu0 %v4680_v34 }
 0xfd6   :  { %3998 = vmatprep.subr.bf16.mxu0 %v4204_v7 }
 0xfd9   :  { %4000 = vmatpush3.bf16.msra.mxu0 %v4690_v37 }
 0xfda   :  { %4001 = vmatprep.subr.bf16.mxu0 %v4204_v7 }
 0xfdc   :  { %3711 = vmatmul.mubr.msk.f32.vlgmr.msra.gmra.mrb[26].mxu0 %vm1940_vm5, %v2175_v60  ;;  %v4780_v60 = vpack.c.bf16 %v2338_v59, %v2337_v58 }
 0xfdd   :  { %4003 = vmatpush3.bf16.msra.mxu0 %v4700_v33  ;;  %3729 = vmatprep.mubr.msk.f32.mxu0 %vm4202_vm0, %v4201_v3 }
 0xfde   :  { %4004 = vmatprep.subr.bf16.mxu0 %v4204_v7 }
 0xfe1   :  { %4006 = vmatpush3.bf16.msra.mxu0 %v4713_v42 }
 0xfe2   :  { %4007 = vmatprep.subr.bf16.mxu0 %v4204_v7 }
 0xfe5   :  { %4009 = vmatpush3.bf16.msra.mxu0 %v4725_v45 }
 0xfe6   :  { %4010 = vmatprep.subr.bf16.mxu0 %v4204_v7 }
 0xfe9   :  { %4012 = vmatpush3.bf16.msra.mxu0 %v4735_v48 }
 0xfea   :  { %4013 = vmatprep.subr.bf16.mxu0 %v4204_v7 }
 0xfec   :  { %3730 = vmatmul.mubr.msk.f32.vlgmr.msra.gmra.mrb[26].mxu0 %vm1940_vm5, %v2257_v4  ;;  %v2415_v4 = vld [vmem:[%s4964_s1 + $0x190] sm:$0xff] }
 0xfed   :  { %4015 = vmatpush3.bf16.msra.mxu0 %v4745_v51  ;;  %3748 = vmatprep.mubr.msk.f32.mxu0 %vm4202_vm0, %v4201_v3  ;;  %v4803_v6 = vpack.c.bf16 %v2416_v5, %v2415_v4 }
 0xfee   :  { %4016 = vmatprep.subr.bf16.mxu0 %v4204_v7 }
 0xff1   :  { %4018 = vmatpush3.bf16.msra.mxu0 %v4758_v54 }
 0xff2   :  { %4019 = vmatprep.subr.bf16.mxu0 %v4204_v7 }
 0xff5   :  { %4021 = vmatpush3.bf16.msra.mxu0 %v4770_v26 }
 0xff6   :  { %4022 = vmatprep.subr.bf16.mxu0 %v4204_v7 }
 0xff9   :  { %4024 = vmatpush3.bf16.msra.mxu0 %v4780_v60 }
 0xffa   :  { %4025 = vmatprep.subr.bf16.mxu0 %v4204_v7 }
 0xffc   :  { %3749 = vmatmul.mubr.msk.f32.vlgmr.msra.gmra.mrb[26].mxu0 %vm1940_vm5, %v2339_v2  ;;  %v4815_v2 = vpack.c.bf16 %v2418_v12, %v2417_v11 }
 0xffd   :  { %4027 = vmatpush3.bf16.msra.mxu0 %v4790_v0  ;;  %3767 = vmatprep.mubr.msk.f32.mxu0 %vm4202_vm0, %v4201_v3 }
 0xffe   :  { %4028 = vmatprep.subr.bf16.mxu0 %v4204_v7 }
0x1001   :  { %4030 = vmatpush3.bf16.msra.mxu0 %v4803_v6 }
0x1002   :  { %4031 = vmatprep.subr.bf16.mxu0 %v4204_v7 }
0x1005   :  { %4033 = vmatpush3.bf16.msra.mxu0 %v4815_v2 }
0x1006   :  { %4034 = vmatprep.subr.bf16.mxu0 %v4204_v7 }
0x1009   :  { %4036 = vmatpush3.bf16.msra.mxu0 %v4825_v18 }
0x100a   :  { %4037 = vmatprep.subr.bf16.mxu0 %v4204_v7 }
0x100c   :  { %3768 = vmatmul.mubr.msk.f32.vlgmr.msra.gmra.mrb[26].mxu0 %vm1940_vm5, %v2421_v10  ;;  %v4860_v10 = vpack.c.bf16 %v2500_v32, %v2499_v30 }
0x100d   :  { %4039 = vmatpush3.bf16.msra.mxu0 %v4835_v22  ;;  %3786 = vmatprep.mubr.msk.f32.mxu0 %vm4202_vm0, %v4201_v3 }
0x100e   :  { %4040 = vmatprep.subr.bf16.mxu0 %v4204_v7 }
0x1011   :  { %4042 = vmatpush3.bf16.msra.mxu0 %v4848_v29 }
0x1012   :  { %4043 = vmatprep.subr.bf16.mxu0 %v4204_v7 }
0x1015   :  { %4045 = vmatpush3.bf16.msra.mxu0 %v4860_v10 }
0x1016   :  { %4046 = vmatprep.subr.bf16.mxu0 %v4204_v7 }
0x1019   :  { %4048 = vmatpush3.bf16.msra.mxu0 %v4870_v36 }
0x101c   :  { %3787 = vmatmul.mubr.msk.f32.vlgmr.msra.gmra.mrb[26].mxu0 %vm1940_vm5, %v2503_v8  ;;  %v2670_v57 = vpop.permute.xlu0 %2669 }
0x101e   :  { %v2596_v38 = vpop.permute.xlu1 %2595 }
0x101f   :  { %3806 = vmatmul.mubr.msk.f32.vlgmr.msra.gmra.mrb[26].mxu1 %vm1940_vm5, %v2596_v38 }
0x1020   :  { %4063 = vmatpush3.bf16.msra.mxu1 %v4545_v24  ;;  %3824 = vmatprep.mubr.msk.f32.mxu1 %vm4202_vm0, %v4201_v3 }
0x1021   :  { %4064 = vmatprep.subr.bf16.mxu1 %v4204_v7 }
0x1022   :  { %v2752_v24 = vpop.permute.xlu1 %2751 }
0x1024   :  { %4066 = vmatpush3.bf16.msra.mxu1 %v4560_v61  ;;  %v2835_v61 = vpop.permute.xlu0 %2834 }
0x1025   :  { %4067 = vmatprep.subr.bf16.mxu1 %v4204_v7 }
0x1028   :  { %4069 = vmatpush3.bf16.msra.mxu1 %v4578_v1  ;;  %v2918_v1 = vpop.permute.xlu1 %2917  ;;  %v3001_v8 = vpop.permute.xlu0 %3000 }
0x1029   :  { %4070 = vmatprep.subr.bf16.mxu1 %v4204_v7 }
0x102c   :  { %4072 = vmatpush3.bf16.msra.mxu1 %v4596_v9  ;;  %v3084_v9 = vpop.permute.xlu1 %3083 }
0x102d   :  { %4073 = vmatprep.subr.bf16.mxu1 %v4204_v7 }
0x102f   :  { %3825 = vmatmul.mubr.msk.f32.vlgmr.msra.gmra.mrb[26].mxu1 %vm1940_vm5, %v2670_v57 }
0x1030   :  { %4075 = vmatpush3.bf16.msra.mxu1 %v4613_v13  ;;  %3843 = vmatprep.mubr.msk.f32.mxu1 %vm4202_vm0, %v4201_v3  ;;  %v3167_v13 = vpop.permute.xlu0 %3166 }
0x1031   :  { %4076 = vmatprep.subr.bf16.mxu1 %v4204_v7 }
0x1034   :  { %4078 = vmatpush3.bf16.msra.mxu1 %v4625_v17 }
0x1035   :  { %4079 = vmatprep.subr.bf16.mxu1 %v4204_v7 }
0x1038   :  { %4081 = vmatpush3.bf16.msra.mxu1 %v4637_v20 }
0x1039   :  { %4082 = vmatprep.subr.bf16.mxu1 %v4204_v7 }
0x103c   :  { %4084 = vmatpush3.bf16.msra.mxu1 %v4647_v23 }
0x103d   :  { %4085 = vmatprep.subr.bf16.mxu1 %v4204_v7 }
0x103f   :  { %3844 = vmatmul.mubr.msk.f32.vlgmr.msra.gmra.mrb[26].mxu1 %vm1940_vm5, %v2752_v24 }
0x1040   :  { %4087 = vmatpush3.bf16.msra.mxu1 %v4657_v28  ;;  %3862 = vmatprep.mubr.msk.f32.mxu1 %vm4202_vm0, %v4201_v3 }
0x1041   :  { %4088 = vmatprep.subr.bf16.mxu1 %v4204_v7 }
0x1044   :  { %4090 = vmatpush3.bf16.msra.mxu1 %v4668_v31 }
0x1045   :  { %4091 = vmatprep.subr.bf16.mxu1 %v4204_v7 }
0x1048   :  { %4093 = vmatpush3.bf16.msra.mxu1 %v4680_v34 }
0x1049   :  { %4094 = vmatprep.subr.bf16.mxu1 %v4204_v7 }
0x104c   :  { %4096 = vmatpush3.bf16.msra.mxu1 %v4690_v37 }
0x104d   :  { %4097 = vmatprep.subr.bf16.mxu1 %v4204_v7 }
0x104f   :  { %3863 = vmatmul.mubr.msk.f32.vlgmr.msra.gmra.mrb[26].mxu1 %vm1940_vm5, %v2835_v61 }
0x1050   :  { %4099 = vmatpush3.bf16.msra.mxu1 %v4700_v33  ;;  %3881 = vmatprep.mubr.msk.f32.mxu1 %vm4202_vm0, %v4201_v3 }
0x1051   :  { %4100 = vmatprep.subr.bf16.mxu1 %v4204_v7 }
0x1054   :  { %4102 = vmatpush3.bf16.msra.mxu1 %v4713_v42 }
0x1055   :  { %4103 = vmatprep.subr.bf16.mxu1 %v4204_v7 }
0x1058   :  { %4105 = vmatpush3.bf16.msra.mxu1 %v4725_v45 }
0x1059   :  { %4106 = vmatprep.subr.bf16.mxu1 %v4204_v7 }
0x105c   :  { %4108 = vmatpush3.bf16.msra.mxu1 %v4735_v48 }
0x105d   :  { %4109 = vmatprep.subr.bf16.mxu1 %v4204_v7 }
0x105f   :  { %3882 = vmatmul.mubr.msk.f32.vlgmr.msra.gmra.mrb[26].mxu1 %vm1940_vm5, %v2918_v1 }
0x1060   :  { %4111 = vmatpush3.bf16.msra.mxu1 %v4745_v51  ;;  %3900 = vmatprep.mubr.msk.f32.mxu1 %vm4202_vm0, %v4201_v3 }
0x1061   :  { %4112 = vmatprep.subr.bf16.mxu1 %v4204_v7 }
0x1064   :  { %4114 = vmatpush3.bf16.msra.mxu1 %v4758_v54 }
0x1065   :  { %4115 = vmatprep.subr.bf16.mxu1 %v4204_v7 }
0x1068   :  { %4117 = vmatpush3.bf16.msra.mxu1 %v4770_v26 }
0x1069   :  { %4118 = vmatprep.subr.bf16.mxu1 %v4204_v7 }
0x106c   :  { %4120 = vmatpush3.bf16.msra.mxu1 %v4780_v60 }
0x106d   :  { %4121 = vmatprep.subr.bf16.mxu1 %v4204_v7 }
0x106f   :  { %3901 = vmatmul.mubr.msk.f32.vlgmr.msra.gmra.mrb[26].mxu1 %vm1940_vm5, %v3001_v8 }
0x1070   :  { %4123 = vmatpush3.bf16.msra.mxu1 %v4790_v0  ;;  %3919 = vmatprep.mubr.msk.f32.mxu1 %vm4202_vm0, %v4201_v3 }
0x1071   :  { %4124 = vmatprep.subr.bf16.mxu1 %v4204_v7 }
0x1074   :  { %4126 = vmatpush3.bf16.msra.mxu1 %v4803_v6 }
0x1075   :  { %4127 = vmatprep.subr.bf16.mxu1 %v4204_v7 }
0x1078   :  { %4129 = vmatpush3.bf16.msra.mxu1 %v4815_v2 }
0x1079   :  { %4130 = vmatprep.subr.bf16.mxu1 %v4204_v7 }
0x107c   :  { %4132 = vmatpush3.bf16.msra.mxu1 %v4825_v18 }
0x107d   :  { %4133 = vmatprep.subr.bf16.mxu1 %v4204_v7 }
0x107f   :  { %3920 = vmatmul.mubr.msk.f32.vlgmr.msra.gmra.mrb[26].mxu1 %vm1940_vm5, %v3084_v9 }
0x1080   :  { %4135 = vmatpush3.bf16.msra.mxu1 %v4835_v22  ;;  %3938 = vmatprep.mubr.msk.f32.mxu1 %vm4202_vm0, %v4201_v3 }
0x1081   :  { %4136 = vmatprep.subr.bf16.mxu1 %v4204_v7 }
0x1084   :  { %4138 = vmatpush3.bf16.msra.mxu1 %v4848_v29 }
0x1085   :  { %4139 = vmatprep.subr.bf16.mxu1 %v4204_v7 }
0x1088   :  { %4141 = vmatpush3.bf16.msra.mxu1 %v4860_v10 }
0x1089   :  { %4142 = vmatprep.subr.bf16.mxu1 %v4204_v7 }
0x108c   :  { %4144 = vmatpush3.bf16.msra.mxu1 %v4870_v36 }
0x108f   :  { %3939 = vmatmul.mubr.msk.f32.vlgmr.msra.gmra.mrb[26].mxu1 %vm1940_vm5, %v3167_v13 }
0x10ef   :  { %v2572_v17 = vpop.f32.mrb[26].mxu0 }
0x10f0   :  { %2578 = vst.msk [vmem:[%s4965_s5] sm:$0x1] %vm2577_vm6, %v2572_v17  ;;  %v3788_v3 = vpop.f32.mrb[27].mxu0 }
0x1162   :  { %v3236_v20 = vpop.f32.mrb[26].mxu1 }
0x1163   :  { %3241 = vst.msk [vmem:[%s4965_s5 + $0x1] sm:$0x1] %vm2577_vm6, %v3236_v20  ;;  %v3940_v23 = vpop.f32.mrb[27].mxu1 }

</bundles_post_ra>
